<compile_context>
chip_gen: v7x
topology: tpu7x:2x2x1
jax: 0.10.0
libtpu: 0.0.40
codegen_flags: <defaults>
</compile_context>

<pallas_src>
import math
import functools

import jax
import jax.numpy as jnp
from jax import lax
from jax.experimental import pallas as pl
from jax.experimental.pallas import tpu as pltpu  # noqa: F401  (kept for TPU-specific tuning hooks)

# ---------------- config (small, deterministic synthetic BERT) ----------------
VOCAB = 128
MAX_POS = 16
HIDDEN = 32
NUM_HEADS = 4
HEAD_DIM = HIDDEN // NUM_HEADS
INTERMEDIATE = 64
NUM_LAYERS = 2
LN_EPS = 1e-12

BATCH = 2
SEQ = 8
BS = BATCH * SEQ              # batch folded into the sublane dim

PER_LAYER_REFS = 12           # Wqkv,bqkv, Wo,bo, ln1g,ln1b, W1,b1, W2,b2, ln2g,ln2b


# ---------------- in-kernel helpers ----------------
def _layernorm(x, gamma, beta):
    # x: (N, H); gamma/beta: (1, H)
    mean = jnp.mean(x, axis=-1, keepdims=True)
    var = jnp.mean((x - mean) ** 2, axis=-1, keepdims=True)
    return (x - mean) * lax.rsqrt(var + LN_EPS) * gamma + beta


def _softmax_rows(s):
    m = jnp.max(s, axis=-1, keepdims=True)
    p = jnp.exp(s - m)
    return p * pl.reciprocal(jnp.sum(p, axis=-1, keepdims=True), approx=True)


def _encoder_layer(x, bias, wqkv, bqkv, wo, bo, ln1g, ln1b, w1, b1, w2, b2, ln2g, ln2b):
    # x: (BS, H); bias: (BS, BS) additive (masks padded keys AND cross-batch pairs)
    qkv = jnp.dot(x, wqkv, preferred_element_type=jnp.float32) + bqkv       # (BS, 3H) one MXU push
    scale = 1.0 / math.sqrt(HEAD_DIM)

    attn_out = jnp.zeros((BS, HIDDEN), jnp.float32)
    for h in range(NUM_HEADS):                                              # static unroll
        lo = h * HEAD_DIM
        q_h = qkv[:, lo:lo + HEAD_DIM]
        k_h = qkv[:, HIDDEN + lo:HIDDEN + lo + HEAD_DIM]
        v_h = qkv[:, 2 * HIDDEN + lo:2 * HIDDEN + lo + HEAD_DIM]
        s = jnp.dot(q_h, k_h.T, preferred_element_type=jnp.float32) * scale + bias   # (BS, BS)
        p = _softmax_rows(s)
        ctx_h = jnp.dot(p, v_h, preferred_element_type=jnp.float32)          # (BS, dh)
        # partial-sum against the matching Wo row block == concat(ctx_h) @ Wo (no lane concat)
        attn_out = attn_out + jnp.dot(ctx_h, wo[lo:lo + HEAD_DIM, :],
                                      preferred_element_type=jnp.float32)
    attn_out = attn_out + bo

    h1 = _layernorm(x + attn_out, ln1g, ln1b)

    ff = jnp.dot(h1, w1, preferred_element_type=jnp.float32) + b1
    # TODO(synk): HF BERT uses erf-based GELU; tanh approximation kept for robust Mosaic lowering.
    ff = jax.nn.gelu(ff, approximate=True)
    ff = jnp.dot(ff, w2, preferred_element_type=jnp.float32) + b2
    return _layernorm(h1 + ff, ln2g, ln2b)


# ---------------- the single fused kernel ----------------
def fused_forward_kernel(x_ref, embg_ref, embb_ref, bias_ref, pool_ref, *rest):
    out_ref = rest[-1]
    layer_refs = rest[:-1]

    # embedding LayerNorm
    x = _layernorm(x_ref[...], embg_ref[...], embb_ref[...])                 # (BS, H)
    bias = bias_ref[...]                                                     # (BS, BS)

    for li in range(NUM_LAYERS):                                             # static unroll over layers
        refs = layer_refs[li * PER_LAYER_REFS:(li + 1) * PER_LAYER_REFS]
        (wqkv, bqkv, wo, bo, ln1g, ln1b, w1, b1, w2, b2, ln2g, ln2b) = [r[...] for r in refs]
        x = _encoder_layer(x, bias, wqkv, bqkv, wo, bo,
                           ln1g, ln1b, w1, b1, w2, b2, ln2g, ln2b)

    # AdaptiveAvgPool1d(1) over seq == block-diagonal (B, B*S) averaging matmul (unmasked mean)
    out_ref[...] = jnp.dot(pool_ref[...], x, preferred_element_type=jnp.float32)   # (B, H)


# ---------------- parameter init (deterministic, synthetic) ----------------
def init_params(key):
    def nrm(k, shape, scale=0.02):
        return scale * jax.random.normal(k, shape, dtype=jnp.float32)

    keys = jax.random.split(key, 4 + NUM_LAYERS)
    params = {
        "word_emb": nrm(keys[0], (VOCAB, HIDDEN)),
        "pos_emb": nrm(keys[1], (MAX_POS, HIDDEN)),
        "type_emb": nrm(keys[2], (2, HIDDEN)),
        "emb_ln_g": jnp.ones((1, HIDDEN), jnp.float32),
        "emb_ln_b": jnp.zeros((1, HIDDEN), jnp.float32),
        "layers": [],
    }
    for li in range(NUM_LAYERS):
        lk = jax.random.split(keys[4 + li], 4)
        layer = (
            nrm(lk[0], (HIDDEN, 3 * HIDDEN)), jnp.zeros((1, 3 * HIDDEN), jnp.float32),     # Wqkv, bqkv (fused)
            nrm(lk[1], (HIDDEN, HIDDEN)), jnp.zeros((1, HIDDEN), jnp.float32),             # Wo, bo
            jnp.ones((1, HIDDEN), jnp.float32), jnp.zeros((1, HIDDEN), jnp.float32),       # ln1 gamma/beta
            nrm(lk[2], (HIDDEN, INTERMEDIATE)), jnp.zeros((1, INTERMEDIATE), jnp.float32), # W1, b1
            nrm(lk[3], (INTERMEDIATE, HIDDEN)), jnp.zeros((1, HIDDEN), jnp.float32),       # W2, b2
            jnp.ones((1, HIDDEN), jnp.float32), jnp.zeros((1, HIDDEN), jnp.float32),       # ln2 gamma/beta
        )
        params["layers"].append(layer)
    return params


# ---------------- forward ----------------
@jax.jit
def sentence_transformer_forward(params, input_ids, attention_mask):
    B, S = input_ids.shape
    # Embedding lookup (gather) is glue — plain JAX; summed embeddings fed to the fused kernel.
    x = (params["word_emb"][input_ids]
         + params["pos_emb"][:S][None, :, :]
         + params["type_emb"][0][None, None, :]).astype(jnp.float32)
    x = x.reshape(B * S, HIDDEN)                                             # fold batch into sublanes

    # (B*S, B*S) additive attention bias: -1e4 on padded keys (matches HF), -1e9 on cross-batch pairs.
    batch_id = jnp.arange(B * S, dtype=jnp.int32) // S
    same_batch = batch_id[:, None] == batch_id[None, :]
    key_mask = attention_mask.reshape(B * S).astype(jnp.float32)
    attn_bias = jnp.where(same_batch, (1.0 - key_mask)[None, :] * -10000.0,
                          jnp.float32(-1e9)).astype(jnp.float32)

    # Block-diagonal averaging matrix: pooled = pool_mat @ x_final  (unmasked mean over seq).
    pool_mat = (jnp.arange(B, dtype=jnp.int32)[:, None] == batch_id[None, :]).astype(jnp.float32) / S

    flat_layers = [w for layer in params["layers"] for w in layer]
    all_inputs = (x, params["emb_ln_g"], params["emb_ln_b"], attn_bias, pool_mat, *flat_layers)

    # Advisory cost estimate so XLA overlaps the embedding gather with the custom call.
    flops_layer = (2 * B * S * HIDDEN * 3 * HIDDEN            # fused QKV
                   + 2 * (B * S) * (B * S) * HIDDEN * 2       # scores + ctx (all heads)
                   + 2 * B * S * HIDDEN * HIDDEN              # Wo partial sums
                   + 4 * B * S * HIDDEN * INTERMEDIATE)       # FFN
    flops = NUM_LAYERS * flops_layer + 2 * B * (B * S) * HIDDEN
    transcendentals = NUM_LAYERS * (NUM_HEADS * (B * S) * (B * S)   # softmax exp
                                    + B * S * INTERMEDIATE          # gelu
                                    + NUM_HEADS * B * S + 2 * B * S) + B * S
    bytes_accessed = sum(int(a.size) * 4 for a in all_inputs) + B * HIDDEN * 4

    return pl.pallas_call(
        fused_forward_kernel,
        out_shape=jax.ShapeDtypeStruct((B, HIDDEN), jnp.float32),
        cost_estimate=pl.CostEstimate(flops=int(flops),
                                      transcendentals=int(transcendentals),
                                      bytes_accessed=int(bytes_accessed)),
    )(*all_inputs)


if __name__ == "__main__":
    key = jax.random.PRNGKey(0)
    pkey, ikey = jax.random.split(key)
    params = init_params(pkey)

    # Synthetic tokenized batch: two "sentences", second one padded.
    input_ids = jax.random.randint(ikey, (BATCH, SEQ), 0, VOCAB, dtype=jnp.int32)
    attention_mask = jnp.array([[1, 1, 1, 1, 1, 1, 1, 1],
                                [1, 1, 1, 1, 1, 0, 0, 0]], dtype=jnp.int32)
    input_ids = input_ids * attention_mask  # pad token id 0 on masked positions

    embeddings = sentence_transformer_forward(params, input_ids, attention_mask)
    jax.block_until_ready(embeddings)
    assert embeddings.shape == (BATCH, HIDDEN)
    assert bool(jnp.all(jnp.isfinite(embeddings)))
    print("KERNEL_OK")
</pallas_src>

<mosaic_0001>
module attributes {stable_mosaic.version = 11 : i64} {
  func.func @fused_forward_kernel(%arg0: memref<16x32xf32, #tpu.memory_space<vmem>>, %arg1: memref<1x32xf32, #tpu.memory_space<vmem>>, %arg2: memref<1x32xf32, #tpu.memory_space<vmem>>, %arg3: memref<16x16xf32, #tpu.memory_space<vmem>>, %arg4: memref<2x16xf32, #tpu.memory_space<vmem>>, %arg5: memref<32x96xf32, #tpu.memory_space<vmem>>, %arg6: memref<1x96xf32, #tpu.memory_space<vmem>>, %arg7: memref<32x32xf32, #tpu.memory_space<vmem>>, %arg8: memref<1x32xf32, #tpu.memory_space<vmem>>, %arg9: memref<1x32xf32, #tpu.memory_space<vmem>>, %arg10: memref<1x32xf32, #tpu.memory_space<vmem>>, %arg11: memref<32x64xf32, #tpu.memory_space<vmem>>, %arg12: memref<1x64xf32, #tpu.memory_space<vmem>>, %arg13: memref<64x32xf32, #tpu.memory_space<vmem>>, %arg14: memref<1x32xf32, #tpu.memory_space<vmem>>, %arg15: memref<1x32xf32, #tpu.memory_space<vmem>>, %arg16: memref<1x32xf32, #tpu.memory_space<vmem>>, %arg17: memref<32x96xf32, #tpu.memory_space<vmem>>, %arg18: memref<1x96xf32, #tpu.memory_space<vmem>>, %arg19: memref<32x32xf32, #tpu.memory_space<vmem>>, %arg20: memref<1x32xf32, #tpu.memory_space<vmem>>, %arg21: memref<1x32xf32, #tpu.memory_space<vmem>>, %arg22: memref<1x32xf32, #tpu.memory_space<vmem>>, %arg23: memref<32x64xf32, #tpu.memory_space<vmem>>, %arg24: memref<1x64xf32, #tpu.memory_space<vmem>>, %arg25: memref<64x32xf32, #tpu.memory_space<vmem>>, %arg26: memref<1x32xf32, #tpu.memory_space<vmem>>, %arg27: memref<1x32xf32, #tpu.memory_space<vmem>>, %arg28: memref<1x32xf32, #tpu.memory_space<vmem>>, %arg29: memref<2x32xf32, #tpu.memory_space<vmem>>) attributes {dimension_semantics = [], scalar_prefetch = 0 : i64, scratch_operands = 0 : i64, tpu.core_type = #tpu.core_type<tc>} {
    %c0 = arith.constant 0 : index
    %c0_0 = arith.constant 0 : index
    %0 = vector.load %arg0[%c0, %c0_0] : memref<16x32xf32, #tpu.memory_space<vmem>>, vector<16x32xf32>
    %c0_1 = arith.constant 0 : index
    %c0_2 = arith.constant 0 : index
    %1 = vector.load %arg1[%c0_1, %c0_2] : memref<1x32xf32, #tpu.memory_space<vmem>>, vector<1x32xf32>
    %c0_3 = arith.constant 0 : index
    %c0_4 = arith.constant 0 : index
    %2 = vector.load %arg2[%c0_3, %c0_4] : memref<1x32xf32, #tpu.memory_space<vmem>>, vector<1x32xf32>
    %cst = arith.constant dense<0.000000e+00> : vector<16xf32>
    %3 = vector.multi_reduction <add>, %0, %cst [1] : vector<16x32xf32> to vector<16xf32>
    %4 = vector.shape_cast %3 : vector<16xf32> to vector<16x1xf32>
    %cst_5 = arith.constant 3.200000e+01 : f32
    %5 = vector.broadcast %cst_5 : f32 to vector<16x1xf32>
    %6 = arith.divf %4, %5 : vector<16x1xf32>
    %7 = vector.broadcast %6 : vector<16x1xf32> to vector<16x32xf32>
    %8 = arith.subf %0, %7 : vector<16x32xf32>
    %9 = arith.mulf %8, %8 : vector<16x32xf32>
    %cst_6 = arith.constant dense<0.000000e+00> : vector<16xf32>
    %10 = vector.multi_reduction <add>, %9, %cst_6 [1] : vector<16x32xf32> to vector<16xf32>
    %11 = vector.shape_cast %10 : vector<16xf32> to vector<16x1xf32>
    %cst_7 = arith.constant 3.200000e+01 : f32
    %12 = vector.broadcast %cst_7 : f32 to vector<16x1xf32>
    %13 = arith.divf %11, %12 : vector<16x1xf32>
    %14 = vector.broadcast %6 : vector<16x1xf32> to vector<16x32xf32>
    %15 = arith.subf %0, %14 : vector<16x32xf32>
    %cst_8 = arith.constant 9.99999996E-13 : f32
    %16 = vector.broadcast %cst_8 : f32 to vector<16x1xf32>
    %17 = arith.addf %13, %16 : vector<16x1xf32>
    %18 = math.rsqrt %17 : vector<16x1xf32>
    %19 = vector.broadcast %18 : vector<16x1xf32> to vector<16x32xf32>
    %20 = arith.mulf %15, %19 : vector<16x32xf32>
    %21 = vector.broadcast %1 : vector<1x32xf32> to vector<16x32xf32>
    %22 = arith.mulf %20, %21 : vector<16x32xf32>
    %23 = vector.broadcast %2 : vector<1x32xf32> to vector<16x32xf32>
    %24 = arith.addf %22, %23 : vector<16x32xf32>
    %c0_9 = arith.constant 0 : index
    %c0_10 = arith.constant 0 : index
    %25 = vector.load %arg3[%c0_9, %c0_10] : memref<16x16xf32, #tpu.memory_space<vmem>>, vector<16x16xf32>
    %c0_11 = arith.constant 0 : index
    %c0_12 = arith.constant 0 : index
    %26 = vector.load %arg5[%c0_11, %c0_12] : memref<32x96xf32, #tpu.memory_space<vmem>>, vector<32x96xf32>
    %c0_13 = arith.constant 0 : index
    %c0_14 = arith.constant 0 : index
    %27 = vector.load %arg6[%c0_13, %c0_14] : memref<1x96xf32, #tpu.memory_space<vmem>>, vector<1x96xf32>
    %c0_15 = arith.constant 0 : index
    %c0_16 = arith.constant 0 : index
    %28 = vector.load %arg7[%c0_15, %c0_16] : memref<32x32xf32, #tpu.memory_space<vmem>>, vector<32x32xf32>
    %c0_17 = arith.constant 0 : index
    %c0_18 = arith.constant 0 : index
    %29 = vector.load %arg8[%c0_17, %c0_18] : memref<1x32xf32, #tpu.memory_space<vmem>>, vector<1x32xf32>
    %c0_19 = arith.constant 0 : index
    %c0_20 = arith.constant 0 : index
    %30 = vector.load %arg9[%c0_19, %c0_20] : memref<1x32xf32, #tpu.memory_space<vmem>>, vector<1x32xf32>
    %c0_21 = arith.constant 0 : index
    %c0_22 = arith.constant 0 : index
    %31 = vector.load %arg10[%c0_21, %c0_22] : memref<1x32xf32, #tpu.memory_space<vmem>>, vector<1x32xf32>
    %c0_23 = arith.constant 0 : index
    %c0_24 = arith.constant 0 : index
    %32 = vector.load %arg11[%c0_23, %c0_24] : memref<32x64xf32, #tpu.memory_space<vmem>>, vector<32x64xf32>
    %c0_25 = arith.constant 0 : index
    %c0_26 = arith.constant 0 : index
    %33 = vector.load %arg12[%c0_25, %c0_26] : memref<1x64xf32, #tpu.memory_space<vmem>>, vector<1x64xf32>
    %c0_27 = arith.constant 0 : index
    %c0_28 = arith.constant 0 : index
    %34 = vector.load %arg13[%c0_27, %c0_28] : memref<64x32xf32, #tpu.memory_space<vmem>>, vector<64x32xf32>
    %c0_29 = arith.constant 0 : index
    %c0_30 = arith.constant 0 : index
    %35 = vector.load %arg14[%c0_29, %c0_30] : memref<1x32xf32, #tpu.memory_space<vmem>>, vector<1x32xf32>
    %c0_31 = arith.constant 0 : index
    %c0_32 = arith.constant 0 : index
    %36 = vector.load %arg15[%c0_31, %c0_32] : memref<1x32xf32, #tpu.memory_space<vmem>>, vector<1x32xf32>
    %c0_33 = arith.constant 0 : index
    %c0_34 = arith.constant 0 : index
    %37 = vector.load %arg16[%c0_33, %c0_34] : memref<1x32xf32, #tpu.memory_space<vmem>>, vector<1x32xf32>
    %cst_35 = arith.constant dense<0.000000e+00> : vector<16x96xf32>
    %38 = tpu.matmul %24, %26, %cst_35 {dimension_numbers = #tpu.dot_dimension_numbers<[1], [0], [0], [1], [0, 0, 1, 1], [], []>} : vector<16x32xf32>, vector<32x96xf32>, vector<16x96xf32> -> vector<16x96xf32>
    %39 = vector.broadcast %27 : vector<1x96xf32> to vector<16x96xf32>
    %40 = arith.addf %38, %39 : vector<16x96xf32>
    %cst_36 = arith.constant 0.000000e+00 : f32
    %41 = vector.broadcast %cst_36 : f32 to vector<16x32xf32>
    %42 = vector.extract_strided_slice %40 {offsets = [0, 0], sizes = [16, 8], strides = [1, 1]} : vector<16x96xf32> to vector<16x8xf32>
    %43 = vector.extract_strided_slice %40 {offsets = [0, 32], sizes = [16, 8], strides = [1, 1]} : vector<16x96xf32> to vector<16x8xf32>
    %44 = vector.extract_strided_slice %40 {offsets = [0, 64], sizes = [16, 8], strides = [1, 1]} : vector<16x96xf32> to vector<16x8xf32>
    %45 = tpu.transpose %43, [1, 0] : vector<16x8xf32> -> vector<8x16xf32>
    %cst_37 = arith.constant dense<0.000000e+00> : vector<16x16xf32>
    %46 = tpu.matmul %42, %45, %cst_37 {dimension_numbers = #tpu.dot_dimension_numbers<[1], [0], [0], [1], [0, 0, 1, 1], [], []>} : vector<16x8xf32>, vector<8x16xf32>, vector<16x16xf32> -> vector<16x16xf32>
    %cst_38 = arith.constant 0.353553385 : f32
    %47 = vector.broadcast %cst_38 : f32 to vector<16x16xf32>
    %48 = arith.mulf %46, %47 : vector<16x16xf32>
    %49 = arith.addf %48, %25 : vector<16x16xf32>
    %cst_39 = arith.constant dense<0xFF800000> : vector<16xf32>
    %50 = vector.multi_reduction <maximumf>, %49, %cst_39 [1] : vector<16x16xf32> to vector<16xf32>
    %51 = vector.shape_cast %50 : vector<16xf32> to vector<16x1xf32>
    %52 = vector.broadcast %51 : vector<16x1xf32> to vector<16x16xf32>
    %53 = arith.subf %49, %52 : vector<16x16xf32>
    %54 = math.exp %53 : vector<16x16xf32>
    %cst_40 = arith.constant dense<0.000000e+00> : vector<16xf32>
    %55 = vector.multi_reduction <add>, %54, %cst_40 [1] : vector<16x16xf32> to vector<16xf32>
    %56 = vector.shape_cast %55 : vector<16xf32> to vector<16x1xf32>
    %57 = tpu.reciprocal %56 {approx = true} : vector<16x1xf32> -> vector<16x1xf32>
    %58 = vector.broadcast %57 : vector<16x1xf32> to vector<16x16xf32>
    %59 = arith.mulf %54, %58 : vector<16x16xf32>
    %cst_41 = arith.constant dense<0.000000e+00> : vector<16x8xf32>
    %60 = tpu.matmul %59, %44, %cst_41 {dimension_numbers = #tpu.dot_dimension_numbers<[1], [0], [0], [1], [0, 0, 1, 1], [], []>} : vector<16x16xf32>, vector<16x8xf32>, vector<16x8xf32> -> vector<16x8xf32>
    %61 = vector.extract_strided_slice %28 {offsets = [0, 0], sizes = [8, 32], strides = [1, 1]} : vector<32x32xf32> to vector<8x32xf32>
    %cst_42 = arith.constant dense<0.000000e+00> : vector<16x32xf32>
    %62 = tpu.matmul %60, %61, %cst_42 {dimension_numbers = #tpu.dot_dimension_numbers<[1], [0], [0], [1], [0, 0, 1, 1], [], []>} : vector<16x8xf32>, vector<8x32xf32>, vector<16x32xf32> -> vector<16x32xf32>
    %63 = arith.addf %41, %62 : vector<16x32xf32>
    %64 = vector.extract_strided_slice %40 {offsets = [0, 8], sizes = [16, 8], strides = [1, 1]} : vector<16x96xf32> to vector<16x8xf32>
    %65 = vector.extract_strided_slice %40 {offsets = [0, 40], sizes = [16, 8], strides = [1, 1]} : vector<16x96xf32> to vector<16x8xf32>
    %66 = vector.extract_strided_slice %40 {offsets = [0, 72], sizes = [16, 8], strides = [1, 1]} : vector<16x96xf32> to vector<16x8xf32>
    %67 = tpu.transpose %65, [1, 0] : vector<16x8xf32> -> vector<8x16xf32>
    %cst_43 = arith.constant dense<0.000000e+00> : vector<16x16xf32>
    %68 = tpu.matmul %64, %67, %cst_43 {dimension_numbers = #tpu.dot_dimension_numbers<[1], [0], [0], [1], [0, 0, 1, 1], [], []>} : vector<16x8xf32>, vector<8x16xf32>, vector<16x16xf32> -> vector<16x16xf32>
    %cst_44 = arith.constant 0.353553385 : f32
    %69 = vector.broadcast %cst_44 : f32 to vector<16x16xf32>
    %70 = arith.mulf %68, %69 : vector<16x16xf32>
    %71 = arith.addf %70, %25 : vector<16x16xf32>
    %cst_45 = arith.constant dense<0xFF800000> : vector<16xf32>
    %72 = vector.multi_reduction <maximumf>, %71, %cst_45 [1] : vector<16x16xf32> to vector<16xf32>
    %73 = vector.shape_cast %72 : vector<16xf32> to vector<16x1xf32>
    %74 = vector.broadcast %73 : vector<16x1xf32> to vector<16x16xf32>
    %75 = arith.subf %71, %74 : vector<16x16xf32>
    %76 = math.exp %75 : vector<16x16xf32>
    %cst_46 = arith.constant dense<0.000000e+00> : vector<16xf32>
    %77 = vector.multi_reduction <add>, %76, %cst_46 [1] : vector<16x16xf32> to vector<16xf32>
    %78 = vector.shape_cast %77 : vector<16xf32> to vector<16x1xf32>
    %79 = tpu.reciprocal %78 {approx = true} : vector<16x1xf32> -> vector<16x1xf32>
    %80 = vector.broadcast %79 : vector<16x1xf32> to vector<16x16xf32>
    %81 = arith.mulf %76, %80 : vector<16x16xf32>
    %cst_47 = arith.constant dense<0.000000e+00> : vector<16x8xf32>
    %82 = tpu.matmul %81, %66, %cst_47 {dimension_numbers = #tpu.dot_dimension_numbers<[1], [0], [0], [1], [0, 0, 1, 1], [], []>} : vector<16x16xf32>, vector<16x8xf32>, vector<16x8xf32> -> vector<16x8xf32>
    %83 = vector.extract_strided_slice %28 {offsets = [8, 0], sizes = [8, 32], strides = [1, 1]} : vector<32x32xf32> to vector<8x32xf32>
    %cst_48 = arith.constant dense<0.000000e+00> : vector<16x32xf32>
    %84 = tpu.matmul %82, %83, %cst_48 {dimension_numbers = #tpu.dot_dimension_numbers<[1], [0], [0], [1], [0, 0, 1, 1], [], []>} : vector<16x8xf32>, vector<8x32xf32>, vector<16x32xf32> -> vector<16x32xf32>
    %85 = arith.addf %63, %84 : vector<16x32xf32>
    %86 = vector.extract_strided_slice %40 {offsets = [0, 16], sizes = [16, 8], strides = [1, 1]} : vector<16x96xf32> to vector<16x8xf32>
    %87 = vector.extract_strided_slice %40 {offsets = [0, 48], sizes = [16, 8], strides = [1, 1]} : vector<16x96xf32> to vector<16x8xf32>
    %88 = vector.extract_strided_slice %40 {offsets = [0, 80], sizes = [16, 8], strides = [1, 1]} : vector<16x96xf32> to vector<16x8xf32>
    %89 = tpu.transpose %87, [1, 0] : vector<16x8xf32> -> vector<8x16xf32>
    %cst_49 = arith.constant dense<0.000000e+00> : vector<16x16xf32>
    %90 = tpu.matmul %86, %89, %cst_49 {dimension_numbers = #tpu.dot_dimension_numbers<[1], [0], [0], [1], [0, 0, 1, 1], [], []>} : vector<16x8xf32>, vector<8x16xf32>, vector<16x16xf32> -> vector<16x16xf32>
    %cst_50 = arith.constant 0.353553385 : f32
    %91 = vector.broadcast %cst_50 : f32 to vector<16x16xf32>
    %92 = arith.mulf %90, %91 : vector<16x16xf32>
    %93 = arith.addf %92, %25 : vector<16x16xf32>
    %cst_51 = arith.constant dense<0xFF800000> : vector<16xf32>
    %94 = vector.multi_reduction <maximumf>, %93, %cst_51 [1] : vector<16x16xf32> to vector<16xf32>
    %95 = vector.shape_cast %94 : vector<16xf32> to vector<16x1xf32>
    %96 = vector.broadcast %95 : vector<16x1xf32> to vector<16x16xf32>
    %97 = arith.subf %93, %96 : vector<16x16xf32>
    %98 = math.exp %97 : vector<16x16xf32>
    %cst_52 = arith.constant dense<0.000000e+00> : vector<16xf32>
    %99 = vector.multi_reduction <add>, %98, %cst_52 [1] : vector<16x16xf32> to vector<16xf32>
    %100 = vector.shape_cast %99 : vector<16xf32> to vector<16x1xf32>
    %101 = tpu.reciprocal %100 {approx = true} : vector<16x1xf32> -> vector<16x1xf32>
    %102 = vector.broadcast %101 : vector<16x1xf32> to vector<16x16xf32>
    %103 = arith.mulf %98, %102 : vector<16x16xf32>
    %cst_53 = arith.constant dense<0.000000e+00> : vector<16x8xf32>
    %104 = tpu.matmul %103, %88, %cst_53 {dimension_numbers = #tpu.dot_dimension_numbers<[1], [0], [0], [1], [0, 0, 1, 1], [], []>} : vector<16x16xf32>, vector<16x8xf32>, vector<16x8xf32> -> vector<16x8xf32>
    %105 = vector.extract_strided_slice %28 {offsets = [16, 0], sizes = [8, 32], strides = [1, 1]} : vector<32x32xf32> to vector<8x32xf32>
    %cst_54 = arith.constant dense<0.000000e+00> : vector<16x32xf32>
    %106 = tpu.matmul %104, %105, %cst_54 {dimension_numbers = #tpu.dot_dimension_numbers<[1], [0], [0], [1], [0, 0, 1, 1], [], []>} : vector<16x8xf32>, vector<8x32xf32>, vector<16x32xf32> -> vector<16x32xf32>
    %107 = arith.addf %85, %106 : vector<16x32xf32>
    %108 = vector.extract_strided_slice %40 {offsets = [0, 24], sizes = [16, 8], strides = [1, 1]} : vector<16x96xf32> to vector<16x8xf32>
    %109 = vector.extract_strided_slice %40 {offsets = [0, 56], sizes = [16, 8], strides = [1, 1]} : vector<16x96xf32> to vector<16x8xf32>
    %110 = vector.extract_strided_slice %40 {offsets = [0, 88], sizes = [16, 8], strides = [1, 1]} : vector<16x96xf32> to vector<16x8xf32>
    %111 = tpu.transpose %109, [1, 0] : vector<16x8xf32> -> vector<8x16xf32>
    %cst_55 = arith.constant dense<0.000000e+00> : vector<16x16xf32>
    %112 = tpu.matmul %108, %111, %cst_55 {dimension_numbers = #tpu.dot_dimension_numbers<[1], [0], [0], [1], [0, 0, 1, 1], [], []>} : vector<16x8xf32>, vector<8x16xf32>, vector<16x16xf32> -> vector<16x16xf32>
    %cst_56 = arith.constant 0.353553385 : f32
    %113 = vector.broadcast %cst_56 : f32 to vector<16x16xf32>
    %114 = arith.mulf %112, %113 : vector<16x16xf32>
    %115 = arith.addf %114, %25 : vector<16x16xf32>
    %cst_57 = arith.constant dense<0xFF800000> : vector<16xf32>
    %116 = vector.multi_reduction <maximumf>, %115, %cst_57 [1] : vector<16x16xf32> to vector<16xf32>
    %117 = vector.shape_cast %116 : vector<16xf32> to vector<16x1xf32>
    %118 = vector.broadcast %117 : vector<16x1xf32> to vector<16x16xf32>
    %119 = arith.subf %115, %118 : vector<16x16xf32>
    %120 = math.exp %119 : vector<16x16xf32>
    %cst_58 = arith.constant dense<0.000000e+00> : vector<16xf32>
    %121 = vector.multi_reduction <add>, %120, %cst_58 [1] : vector<16x16xf32> to vector<16xf32>
    %122 = vector.shape_cast %121 : vector<16xf32> to vector<16x1xf32>
    %123 = tpu.reciprocal %122 {approx = true} : vector<16x1xf32> -> vector<16x1xf32>
    %124 = vector.broadcast %123 : vector<16x1xf32> to vector<16x16xf32>
    %125 = arith.mulf %120, %124 : vector<16x16xf32>
    %cst_59 = arith.constant dense<0.000000e+00> : vector<16x8xf32>
    %126 = tpu.matmul %125, %110, %cst_59 {dimension_numbers = #tpu.dot_dimension_numbers<[1], [0], [0], [1], [0, 0, 1, 1], [], []>} : vector<16x16xf32>, vector<16x8xf32>, vector<16x8xf32> -> vector<16x8xf32>
    %127 = vector.extract_strided_slice %28 {offsets = [24, 0], sizes = [8, 32], strides = [1, 1]} : vector<32x32xf32> to vector<8x32xf32>
    %cst_60 = arith.constant dense<0.000000e+00> : vector<16x32xf32>
    %128 = tpu.matmul %126, %127, %cst_60 {dimension_numbers = #tpu.dot_dimension_numbers<[1], [0], [0], [1], [0, 0, 1, 1], [], []>} : vector<16x8xf32>, vector<8x32xf32>, vector<16x32xf32> -> vector<16x32xf32>
    %129 = arith.addf %107, %128 : vector<16x32xf32>
    %130 = vector.broadcast %29 : vector<1x32xf32> to vector<16x32xf32>
    %131 = arith.addf %129, %130 : vector<16x32xf32>
    %132 = arith.addf %24, %131 : vector<16x32xf32>
    %cst_61 = arith.constant dense<0.000000e+00> : vector<16xf32>
    %133 = vector.multi_reduction <add>, %132, %cst_61 [1] : vector<16x32xf32> to vector<16xf32>
    %134 = vector.shape_cast %133 : vector<16xf32> to vector<16x1xf32>
    %cst_62 = arith.constant 3.200000e+01 : f32
    %135 = vector.broadcast %cst_62 : f32 to vector<16x1xf32>
    %136 = arith.divf %134, %135 : vector<16x1xf32>
    %137 = vector.broadcast %136 : vector<16x1xf32> to vector<16x32xf32>
    %138 = arith.subf %132, %137 : vector<16x32xf32>
    %139 = arith.mulf %138, %138 : vector<16x32xf32>
    %cst_63 = arith.constant dense<0.000000e+00> : vector<16xf32>
    %140 = vector.multi_reduction <add>, %139, %cst_63 [1] : vector<16x32xf32> to vector<16xf32>
    %141 = vector.shape_cast %140 : vector<16xf32> to vector<16x1xf32>
    %cst_64 = arith.constant 3.200000e+01 : f32
    %142 = vector.broadcast %cst_64 : f32 to vector<16x1xf32>
    %143 = arith.divf %141, %142 : vector<16x1xf32>
    %144 = vector.broadcast %136 : vector<16x1xf32> to vector<16x32xf32>
    %145 = arith.subf %132, %144 : vector<16x32xf32>
    %cst_65 = arith.constant 9.99999996E-13 : f32
    %146 = vector.broadcast %cst_65 : f32 to vector<16x1xf32>
    %147 = arith.addf %143, %146 : vector<16x1xf32>
    %148 = math.rsqrt %147 : vector<16x1xf32>
    %149 = vector.broadcast %148 : vector<16x1xf32> to vector<16x32xf32>
    %150 = arith.mulf %145, %149 : vector<16x32xf32>
    %151 = vector.broadcast %30 : vector<1x32xf32> to vector<16x32xf32>
    %152 = arith.mulf %150, %151 : vector<16x32xf32>
    %153 = vector.broadcast %31 : vector<1x32xf32> to vector<16x32xf32>
    %154 = arith.addf %152, %153 : vector<16x32xf32>
    %cst_66 = arith.constant dense<0.000000e+00> : vector<16x64xf32>
    %155 = tpu.matmul %154, %32, %cst_66 {dimension_numbers = #tpu.dot_dimension_numbers<[1], [0], [0], [1], [0, 0, 1, 1], [], []>} : vector<16x32xf32>, vector<32x64xf32>, vector<16x64xf32> -> vector<16x64xf32>
    %156 = vector.broadcast %33 : vector<1x64xf32> to vector<16x64xf32>
    %157 = arith.addf %155, %156 : vector<16x64xf32>
    %158 = arith.mulf %157, %157 : vector<16x64xf32>
    %159 = arith.mulf %157, %158 : vector<16x64xf32>
    %cst_67 = arith.constant 4.471500e-02 : f32
    %160 = vector.broadcast %cst_67 : f32 to vector<16x64xf32>
    %161 = arith.mulf %160, %159 : vector<16x64xf32>
    %162 = arith.addf %157, %161 : vector<16x64xf32>
    %cst_68 = arith.constant 0.797884583 : f32
    %163 = vector.broadcast %cst_68 : f32 to vector<16x64xf32>
    %164 = arith.mulf %163, %162 : vector<16x64xf32>
    %165 = math.tanh %164 : vector<16x64xf32>
    %cst_69 = arith.constant 1.000000e+00 : f32
    %166 = vector.broadcast %cst_69 : f32 to vector<16x64xf32>
    %167 = arith.addf %166, %165 : vector<16x64xf32>
    %cst_70 = arith.constant 5.000000e-01 : f32
    %168 = vector.broadcast %cst_70 : f32 to vector<16x64xf32>
    %169 = arith.mulf %168, %167 : vector<16x64xf32>
    %170 = arith.mulf %157, %169 : vector<16x64xf32>
    %cst_71 = arith.constant dense<0.000000e+00> : vector<16x32xf32>
    %171 = tpu.matmul %170, %34, %cst_71 {dimension_numbers = #tpu.dot_dimension_numbers<[1], [0], [0], [1], [0, 0, 1, 1], [], []>} : vector<16x64xf32>, vector<64x32xf32>, vector<16x32xf32> -> vector<16x32xf32>
    %172 = vector.broadcast %35 : vector<1x32xf32> to vector<16x32xf32>
    %173 = arith.addf %171, %172 : vector<16x32xf32>
    %174 = arith.addf %154, %173 : vector<16x32xf32>
    %cst_72 = arith.constant dense<0.000000e+00> : vector<16xf32>
    %175 = vector.multi_reduction <add>, %174, %cst_72 [1] : vector<16x32xf32> to vector<16xf32>
    %176 = vector.shape_cast %175 : vector<16xf32> to vector<16x1xf32>
    %cst_73 = arith.constant 3.200000e+01 : f32
    %177 = vector.broadcast %cst_73 : f32 to vector<16x1xf32>
    %178 = arith.divf %176, %177 : vector<16x1xf32>
    %179 = vector.broadcast %178 : vector<16x1xf32> to vector<16x32xf32>
    %180 = arith.subf %174, %179 : vector<16x32xf32>
    %181 = arith.mulf %180, %180 : vector<16x32xf32>
    %cst_74 = arith.constant dense<0.000000e+00> : vector<16xf32>
    %182 = vector.multi_reduction <add>, %181, %cst_74 [1] : vector<16x32xf32> to vector<16xf32>
    %183 = vector.shape_cast %182 : vector<16xf32> to vector<16x1xf32>
    %cst_75 = arith.constant 3.200000e+01 : f32
    %184 = vector.broadcast %cst_75 : f32 to vector<16x1xf32>
    %185 = arith.divf %183, %184 : vector<16x1xf32>
    %186 = vector.broadcast %178 : vector<16x1xf32> to vector<16x32xf32>
    %187 = arith.subf %174, %186 : vector<16x32xf32>
    %cst_76 = arith.constant 9.99999996E-13 : f32
    %188 = vector.broadcast %cst_76 : f32 to vector<16x1xf32>
    %189 = arith.addf %185, %188 : vector<16x1xf32>
    %190 = math.rsqrt %189 : vector<16x1xf32>
    %191 = vector.broadcast %190 : vector<16x1xf32> to vector<16x32xf32>
    %192 = arith.mulf %187, %191 : vector<16x32xf32>
    %193 = vector.broadcast %36 : vector<1x32xf32> to vector<16x32xf32>
    %194 = arith.mulf %192, %193 : vector<16x32xf32>
    %195 = vector.broadcast %37 : vector<1x32xf32> to vector<16x32xf32>
    %196 = arith.addf %194, %195 : vector<16x32xf32>
    %c0_77 = arith.constant 0 : index
    %c0_78 = arith.constant 0 : index
    %197 = vector.load %arg17[%c0_77, %c0_78] : memref<32x96xf32, #tpu.memory_space<vmem>>, vector<32x96xf32>
    %c0_79 = arith.constant 0 : index
    %c0_80 = arith.constant 0 : index
    %198 = vector.load %arg18[%c0_79, %c0_80] : memref<1x96xf32, #tpu.memory_space<vmem>>, vector<1x96xf32>
    %c0_81 = arith.constant 0 : index
    %c0_82 = arith.constant 0 : index
    %199 = vector.load %arg19[%c0_81, %c0_82] : memref<32x32xf32, #tpu.memory_space<vmem>>, vector<32x32xf32>
    %c0_83 = arith.constant 0 : index
    %c0_84 = arith.constant 0 : index
    %200 = vector.load %arg20[%c0_83, %c0_84] : memref<1x32xf32, #tpu.memory_space<vmem>>, vector<1x32xf32>
    %c0_85 = arith.constant 0 : index
    %c0_86 = arith.constant 0 : index
    %201 = vector.load %arg21[%c0_85, %c0_86] : memref<1x32xf32, #tpu.memory_space<vmem>>, vector<1x32xf32>
    %c0_87 = arith.constant 0 : index
    %c0_88 = arith.constant 0 : index
    %202 = vector.load %arg22[%c0_87, %c0_88] : memref<1x32xf32, #tpu.memory_space<vmem>>, vector<1x32xf32>
    %c0_89 = arith.constant 0 : index
    %c0_90 = arith.constant 0 : index
    %203 = vector.load %arg23[%c0_89, %c0_90] : memref<32x64xf32, #tpu.memory_space<vmem>>, vector<32x64xf32>
    %c0_91 = arith.constant 0 : index
    %c0_92 = arith.constant 0 : index
    %204 = vector.load %arg24[%c0_91, %c0_92] : memref<1x64xf32, #tpu.memory_space<vmem>>, vector<1x64xf32>
    %c0_93 = arith.constant 0 : index
    %c0_94 = arith.constant 0 : index
    %205 = vector.load %arg25[%c0_93, %c0_94] : memref<64x32xf32, #tpu.memory_space<vmem>>, vector<64x32xf32>
    %c0_95 = arith.constant 0 : index
    %c0_96 = arith.constant 0 : index
    %206 = vector.load %arg26[%c0_95, %c0_96] : memref<1x32xf32, #tpu.memory_space<vmem>>, vector<1x32xf32>
    %c0_97 = arith.constant 0 : index
    %c0_98 = arith.constant 0 : index
    %207 = vector.load %arg27[%c0_97, %c0_98] : memref<1x32xf32, #tpu.memory_space<vmem>>, vector<1x32xf32>
    %c0_99 = arith.constant 0 : index
    %c0_100 = arith.constant 0 : index
    %208 = vector.load %arg28[%c0_99, %c0_100] : memref<1x32xf32, #tpu.memory_space<vmem>>, vector<1x32xf32>
    %cst_101 = arith.constant dense<0.000000e+00> : vector<16x96xf32>
    %209 = tpu.matmul %196, %197, %cst_101 {dimension_numbers = #tpu.dot_dimension_numbers<[1], [0], [0], [1], [0, 0, 1, 1], [], []>} : vector<16x32xf32>, vector<32x96xf32>, vector<16x96xf32> -> vector<16x96xf32>
    %210 = vector.broadcast %198 : vector<1x96xf32> to vector<16x96xf32>
    %211 = arith.addf %209, %210 : vector<16x96xf32>
    %cst_102 = arith.constant 0.000000e+00 : f32
    %212 = vector.broadcast %cst_102 : f32 to vector<16x32xf32>
    %213 = vector.extract_strided_slice %211 {offsets = [0, 0], sizes = [16, 8], strides = [1, 1]} : vector<16x96xf32> to vector<16x8xf32>
    %214 = vector.extract_strided_slice %211 {offsets = [0, 32], sizes = [16, 8], strides = [1, 1]} : vector<16x96xf32> to vector<16x8xf32>
    %215 = vector.extract_strided_slice %211 {offsets = [0, 64], sizes = [16, 8], strides = [1, 1]} : vector<16x96xf32> to vector<16x8xf32>
    %216 = tpu.transpose %214, [1, 0] : vector<16x8xf32> -> vector<8x16xf32>
    %cst_103 = arith.constant dense<0.000000e+00> : vector<16x16xf32>
    %217 = tpu.matmul %213, %216, %cst_103 {dimension_numbers = #tpu.dot_dimension_numbers<[1], [0], [0], [1], [0, 0, 1, 1], [], []>} : vector<16x8xf32>, vector<8x16xf32>, vector<16x16xf32> -> vector<16x16xf32>
    %cst_104 = arith.constant 0.353553385 : f32
    %218 = vector.broadcast %cst_104 : f32 to vector<16x16xf32>
    %219 = arith.mulf %217, %218 : vector<16x16xf32>
    %220 = arith.addf %219, %25 : vector<16x16xf32>
    %cst_105 = arith.constant dense<0xFF800000> : vector<16xf32>
    %221 = vector.multi_reduction <maximumf>, %220, %cst_105 [1] : vector<16x16xf32> to vector<16xf32>
    %222 = vector.shape_cast %221 : vector<16xf32> to vector<16x1xf32>
    %223 = vector.broadcast %222 : vector<16x1xf32> to vector<16x16xf32>
    %224 = arith.subf %220, %223 : vector<16x16xf32>
    %225 = math.exp %224 : vector<16x16xf32>
    %cst_106 = arith.constant dense<0.000000e+00> : vector<16xf32>
    %226 = vector.multi_reduction <add>, %225, %cst_106 [1] : vector<16x16xf32> to vector<16xf32>
    %227 = vector.shape_cast %226 : vector<16xf32> to vector<16x1xf32>
    %228 = tpu.reciprocal %227 {approx = true} : vector<16x1xf32> -> vector<16x1xf32>
    %229 = vector.broadcast %228 : vector<16x1xf32> to vector<16x16xf32>
    %230 = arith.mulf %225, %229 : vector<16x16xf32>
    %cst_107 = arith.constant dense<0.000000e+00> : vector<16x8xf32>
    %231 = tpu.matmul %230, %215, %cst_107 {dimension_numbers = #tpu.dot_dimension_numbers<[1], [0], [0], [1], [0, 0, 1, 1], [], []>} : vector<16x16xf32>, vector<16x8xf32>, vector<16x8xf32> -> vector<16x8xf32>
    %232 = vector.extract_strided_slice %199 {offsets = [0, 0], sizes = [8, 32], strides = [1, 1]} : vector<32x32xf32> to vector<8x32xf32>
    %cst_108 = arith.constant dense<0.000000e+00> : vector<16x32xf32>
    %233 = tpu.matmul %231, %232, %cst_108 {dimension_numbers = #tpu.dot_dimension_numbers<[1], [0], [0], [1], [0, 0, 1, 1], [], []>} : vector<16x8xf32>, vector<8x32xf32>, vector<16x32xf32> -> vector<16x32xf32>
    %234 = arith.addf %212, %233 : vector<16x32xf32>
    %235 = vector.extract_strided_slice %211 {offsets = [0, 8], sizes = [16, 8], strides = [1, 1]} : vector<16x96xf32> to vector<16x8xf32>
    %236 = vector.extract_strided_slice %211 {offsets = [0, 40], sizes = [16, 8], strides = [1, 1]} : vector<16x96xf32> to vector<16x8xf32>
    %237 = vector.extract_strided_slice %211 {offsets = [0, 72], sizes = [16, 8], strides = [1, 1]} : vector<16x96xf32> to vector<16x8xf32>
    %238 = tpu.transpose %236, [1, 0] : vector<16x8xf32> -> vector<8x16xf32>
    %cst_109 = arith.constant dense<0.000000e+00> : vector<16x16xf32>
    %239 = tpu.matmul %235, %238, %cst_109 {dimension_numbers = #tpu.dot_dimension_numbers<[1], [0], [0], [1], [0, 0, 1, 1], [], []>} : vector<16x8xf32>, vector<8x16xf32>, vector<16x16xf32> -> vector<16x16xf32>
    %cst_110 = arith.constant 0.353553385 : f32
    %240 = vector.broadcast %cst_110 : f32 to vector<16x16xf32>
    %241 = arith.mulf %239, %240 : vector<16x16xf32>
    %242 = arith.addf %241, %25 : vector<16x16xf32>
    %cst_111 = arith.constant dense<0xFF800000> : vector<16xf32>
    %243 = vector.multi_reduction <maximumf>, %242, %cst_111 [1] : vector<16x16xf32> to vector<16xf32>
    %244 = vector.shape_cast %243 : vector<16xf32> to vector<16x1xf32>
    %245 = vector.broadcast %244 : vector<16x1xf32> to vector<16x16xf32>
    %246 = arith.subf %242, %245 : vector<16x16xf32>
    %247 = math.exp %246 : vector<16x16xf32>
    %cst_112 = arith.constant dense<0.000000e+00> : vector<16xf32>
    %248 = vector.multi_reduction <add>, %247, %cst_112 [1] : vector<16x16xf32> to vector<16xf32>
    %249 = vector.shape_cast %248 : vector<16xf32> to vector<16x1xf32>
    %250 = tpu.reciprocal %249 {approx = true} : vector<16x1xf32> -> vector<16x1xf32>
    %251 = vector.broadcast %250 : vector<16x1xf32> to vector<16x16xf32>
    %252 = arith.mulf %247, %251 : vector<16x16xf32>
    %cst_113 = arith.constant dense<0.000000e+00> : vector<16x8xf32>
    %253 = tpu.matmul %252, %237, %cst_113 {dimension_numbers = #tpu.dot_dimension_numbers<[1], [0], [0], [1], [0, 0, 1, 1], [], []>} : vector<16x16xf32>, vector<16x8xf32>, vector<16x8xf32> -> vector<16x8xf32>
    %254 = vector.extract_strided_slice %199 {offsets = [8, 0], sizes = [8, 32], strides = [1, 1]} : vector<32x32xf32> to vector<8x32xf32>
    %cst_114 = arith.constant dense<0.000000e+00> : vector<16x32xf32>
    %255 = tpu.matmul %253, %254, %cst_114 {dimension_numbers = #tpu.dot_dimension_numbers<[1], [0], [0], [1], [0, 0, 1, 1], [], []>} : vector<16x8xf32>, vector<8x32xf32>, vector<16x32xf32> -> vector<16x32xf32>
    %256 = arith.addf %234, %255 : vector<16x32xf32>
    %257 = vector.extract_strided_slice %211 {offsets = [0, 16], sizes = [16, 8], strides = [1, 1]} : vector<16x96xf32> to vector<16x8xf32>
    %258 = vector.extract_strided_slice %211 {offsets = [0, 48], sizes = [16, 8], strides = [1, 1]} : vector<16x96xf32> to vector<16x8xf32>
    %259 = vector.extract_strided_slice %211 {offsets = [0, 80], sizes = [16, 8], strides = [1, 1]} : vector<16x96xf32> to vector<16x8xf32>
    %260 = tpu.transpose %258, [1, 0] : vector<16x8xf32> -> vector<8x16xf32>
    %cst_115 = arith.constant dense<0.000000e+00> : vector<16x16xf32>
    %261 = tpu.matmul %257, %260, %cst_115 {dimension_numbers = #tpu.dot_dimension_numbers<[1], [0], [0], [1], [0, 0, 1, 1], [], []>} : vector<16x8xf32>, vector<8x16xf32>, vector<16x16xf32> -> vector<16x16xf32>
    %cst_116 = arith.constant 0.353553385 : f32
    %262 = vector.broadcast %cst_116 : f32 to vector<16x16xf32>
    %263 = arith.mulf %261, %262 : vector<16x16xf32>
    %264 = arith.addf %263, %25 : vector<16x16xf32>
    %cst_117 = arith.constant dense<0xFF800000> : vector<16xf32>
    %265 = vector.multi_reduction <maximumf>, %264, %cst_117 [1] : vector<16x16xf32> to vector<16xf32>
    %266 = vector.shape_cast %265 : vector<16xf32> to vector<16x1xf32>
    %267 = vector.broadcast %266 : vector<16x1xf32> to vector<16x16xf32>
    %268 = arith.subf %264, %267 : vector<16x16xf32>
    %269 = math.exp %268 : vector<16x16xf32>
    %cst_118 = arith.constant dense<0.000000e+00> : vector<16xf32>
    %270 = vector.multi_reduction <add>, %269, %cst_118 [1] : vector<16x16xf32> to vector<16xf32>
    %271 = vector.shape_cast %270 : vector<16xf32> to vector<16x1xf32>
    %272 = tpu.reciprocal %271 {approx = true} : vector<16x1xf32> -> vector<16x1xf32>
    %273 = vector.broadcast %272 : vector<16x1xf32> to vector<16x16xf32>
    %274 = arith.mulf %269, %273 : vector<16x16xf32>
    %cst_119 = arith.constant dense<0.000000e+00> : vector<16x8xf32>
    %275 = tpu.matmul %274, %259, %cst_119 {dimension_numbers = #tpu.dot_dimension_numbers<[1], [0], [0], [1], [0, 0, 1, 1], [], []>} : vector<16x16xf32>, vector<16x8xf32>, vector<16x8xf32> -> vector<16x8xf32>
    %276 = vector.extract_strided_slice %199 {offsets = [16, 0], sizes = [8, 32], strides = [1, 1]} : vector<32x32xf32> to vector<8x32xf32>
    %cst_120 = arith.constant dense<0.000000e+00> : vector<16x32xf32>
    %277 = tpu.matmul %275, %276, %cst_120 {dimension_numbers = #tpu.dot_dimension_numbers<[1], [0], [0], [1], [0, 0, 1, 1], [], []>} : vector<16x8xf32>, vector<8x32xf32>, vector<16x32xf32> -> vector<16x32xf32>
    %278 = arith.addf %256, %277 : vector<16x32xf32>
    %279 = vector.extract_strided_slice %211 {offsets = [0, 24], sizes = [16, 8], strides = [1, 1]} : vector<16x96xf32> to vector<16x8xf32>
    %280 = vector.extract_strided_slice %211 {offsets = [0, 56], sizes = [16, 8], strides = [1, 1]} : vector<16x96xf32> to vector<16x8xf32>
    %281 = vector.extract_strided_slice %211 {offsets = [0, 88], sizes = [16, 8], strides = [1, 1]} : vector<16x96xf32> to vector<16x8xf32>
    %282 = tpu.transpose %280, [1, 0] : vector<16x8xf32> -> vector<8x16xf32>
    %cst_121 = arith.constant dense<0.000000e+00> : vector<16x16xf32>
    %283 = tpu.matmul %279, %282, %cst_121 {dimension_numbers = #tpu.dot_dimension_numbers<[1], [0], [0], [1], [0, 0, 1, 1], [], []>} : vector<16x8xf32>, vector<8x16xf32>, vector<16x16xf32> -> vector<16x16xf32>
    %cst_122 = arith.constant 0.353553385 : f32
    %284 = vector.broadcast %cst_122 : f32 to vector<16x16xf32>
    %285 = arith.mulf %283, %284 : vector<16x16xf32>
    %286 = arith.addf %285, %25 : vector<16x16xf32>
    %cst_123 = arith.constant dense<0xFF800000> : vector<16xf32>
    %287 = vector.multi_reduction <maximumf>, %286, %cst_123 [1] : vector<16x16xf32> to vector<16xf32>
    %288 = vector.shape_cast %287 : vector<16xf32> to vector<16x1xf32>
    %289 = vector.broadcast %288 : vector<16x1xf32> to vector<16x16xf32>
    %290 = arith.subf %286, %289 : vector<16x16xf32>
    %291 = math.exp %290 : vector<16x16xf32>
    %cst_124 = arith.constant dense<0.000000e+00> : vector<16xf32>
    %292 = vector.multi_reduction <add>, %291, %cst_124 [1] : vector<16x16xf32> to vector<16xf32>
    %293 = vector.shape_cast %292 : vector<16xf32> to vector<16x1xf32>
    %294 = tpu.reciprocal %293 {approx = true} : vector<16x1xf32> -> vector<16x1xf32>
    %295 = vector.broadcast %294 : vector<16x1xf32> to vector<16x16xf32>
    %296 = arith.mulf %291, %295 : vector<16x16xf32>
    %cst_125 = arith.constant dense<0.000000e+00> : vector<16x8xf32>
    %297 = tpu.matmul %296, %281, %cst_125 {dimension_numbers = #tpu.dot_dimension_numbers<[1], [0], [0], [1], [0, 0, 1, 1], [], []>} : vector<16x16xf32>, vector<16x8xf32>, vector<16x8xf32> -> vector<16x8xf32>
    %298 = vector.extract_strided_slice %199 {offsets = [24, 0], sizes = [8, 32], strides = [1, 1]} : vector<32x32xf32> to vector<8x32xf32>
    %cst_126 = arith.constant dense<0.000000e+00> : vector<16x32xf32>
    %299 = tpu.matmul %297, %298, %cst_126 {dimension_numbers = #tpu.dot_dimension_numbers<[1], [0], [0], [1], [0, 0, 1, 1], [], []>} : vector<16x8xf32>, vector<8x32xf32>, vector<16x32xf32> -> vector<16x32xf32>
    %300 = arith.addf %278, %299 : vector<16x32xf32>
    %301 = vector.broadcast %200 : vector<1x32xf32> to vector<16x32xf32>
    %302 = arith.addf %300, %301 : vector<16x32xf32>
    %303 = arith.addf %196, %302 : vector<16x32xf32>
    %cst_127 = arith.constant dense<0.000000e+00> : vector<16xf32>
    %304 = vector.multi_reduction <add>, %303, %cst_127 [1] : vector<16x32xf32> to vector<16xf32>
    %305 = vector.shape_cast %304 : vector<16xf32> to vector<16x1xf32>
    %cst_128 = arith.constant 3.200000e+01 : f32
    %306 = vector.broadcast %cst_128 : f32 to vector<16x1xf32>
    %307 = arith.divf %305, %306 : vector<16x1xf32>
    %308 = vector.broadcast %307 : vector<16x1xf32> to vector<16x32xf32>
    %309 = arith.subf %303, %308 : vector<16x32xf32>
    %310 = arith.mulf %309, %309 : vector<16x32xf32>
    %cst_129 = arith.constant dense<0.000000e+00> : vector<16xf32>
    %311 = vector.multi_reduction <add>, %310, %cst_129 [1] : vector<16x32xf32> to vector<16xf32>
    %312 = vector.shape_cast %311 : vector<16xf32> to vector<16x1xf32>
    %cst_130 = arith.constant 3.200000e+01 : f32
    %313 = vector.broadcast %cst_130 : f32 to vector<16x1xf32>
    %314 = arith.divf %312, %313 : vector<16x1xf32>
    %315 = vector.broadcast %307 : vector<16x1xf32> to vector<16x32xf32>
    %316 = arith.subf %303, %315 : vector<16x32xf32>
    %cst_131 = arith.constant 9.99999996E-13 : f32
    %317 = vector.broadcast %cst_131 : f32 to vector<16x1xf32>
    %318 = arith.addf %314, %317 : vector<16x1xf32>
    %319 = math.rsqrt %318 : vector<16x1xf32>
    %320 = vector.broadcast %319 : vector<16x1xf32> to vector<16x32xf32>
    %321 = arith.mulf %316, %320 : vector<16x32xf32>
    %322 = vector.broadcast %201 : vector<1x32xf32> to vector<16x32xf32>
    %323 = arith.mulf %321, %322 : vector<16x32xf32>
    %324 = vector.broadcast %202 : vector<1x32xf32> to vector<16x32xf32>
    %325 = arith.addf %323, %324 : vector<16x32xf32>
    %cst_132 = arith.constant dense<0.000000e+00> : vector<16x64xf32>
    %326 = tpu.matmul %325, %203, %cst_132 {dimension_numbers = #tpu.dot_dimension_numbers<[1], [0], [0], [1], [0, 0, 1, 1], [], []>} : vector<16x32xf32>, vector<32x64xf32>, vector<16x64xf32> -> vector<16x64xf32>
    %327 = vector.broadcast %204 : vector<1x64xf32> to vector<16x64xf32>
    %328 = arith.addf %326, %327 : vector<16x64xf32>
    %329 = arith.mulf %328, %328 : vector<16x64xf32>
    %330 = arith.mulf %328, %329 : vector<16x64xf32>
    %cst_133 = arith.constant 4.471500e-02 : f32
    %331 = vector.broadcast %cst_133 : f32 to vector<16x64xf32>
    %332 = arith.mulf %331, %330 : vector<16x64xf32>
    %333 = arith.addf %328, %332 : vector<16x64xf32>
    %cst_134 = arith.constant 0.797884583 : f32
    %334 = vector.broadcast %cst_134 : f32 to vector<16x64xf32>
    %335 = arith.mulf %334, %333 : vector<16x64xf32>
    %336 = math.tanh %335 : vector<16x64xf32>
    %cst_135 = arith.constant 1.000000e+00 : f32
    %337 = vector.broadcast %cst_135 : f32 to vector<16x64xf32>
    %338 = arith.addf %337, %336 : vector<16x64xf32>
    %cst_136 = arith.constant 5.000000e-01 : f32
    %339 = vector.broadcast %cst_136 : f32 to vector<16x64xf32>
    %340 = arith.mulf %339, %338 : vector<16x64xf32>
    %341 = arith.mulf %328, %340 : vector<16x64xf32>
    %cst_137 = arith.constant dense<0.000000e+00> : vector<16x32xf32>
    %342 = tpu.matmul %341, %205, %cst_137 {dimension_numbers = #tpu.dot_dimension_numbers<[1], [0], [0], [1], [0, 0, 1, 1], [], []>} : vector<16x64xf32>, vector<64x32xf32>, vector<16x32xf32> -> vector<16x32xf32>
    %343 = vector.broadcast %206 : vector<1x32xf32> to vector<16x32xf32>
    %344 = arith.addf %342, %343 : vector<16x32xf32>
    %345 = arith.addf %325, %344 : vector<16x32xf32>
    %cst_138 = arith.constant dense<0.000000e+00> : vector<16xf32>
    %346 = vector.multi_reduction <add>, %345, %cst_138 [1] : vector<16x32xf32> to vector<16xf32>
    %347 = vector.shape_cast %346 : vector<16xf32> to vector<16x1xf32>
    %cst_139 = arith.constant 3.200000e+01 : f32
    %348 = vector.broadcast %cst_139 : f32 to vector<16x1xf32>
    %349 = arith.divf %347, %348 : vector<16x1xf32>
    %350 = vector.broadcast %349 : vector<16x1xf32> to vector<16x32xf32>
    %351 = arith.subf %345, %350 : vector<16x32xf32>
    %352 = arith.mulf %351, %351 : vector<16x32xf32>
    %cst_140 = arith.constant dense<0.000000e+00> : vector<16xf32>
    %353 = vector.multi_reduction <add>, %352, %cst_140 [1] : vector<16x32xf32> to vector<16xf32>
    %354 = vector.shape_cast %353 : vector<16xf32> to vector<16x1xf32>
    %cst_141 = arith.constant 3.200000e+01 : f32
    %355 = vector.broadcast %cst_141 : f32 to vector<16x1xf32>
    %356 = arith.divf %354, %355 : vector<16x1xf32>
    %357 = vector.broadcast %349 : vector<16x1xf32> to vector<16x32xf32>
    %358 = arith.subf %345, %357 : vector<16x32xf32>
    %cst_142 = arith.constant 9.99999996E-13 : f32
    %359 = vector.broadcast %cst_142 : f32 to vector<16x1xf32>
    %360 = arith.addf %356, %359 : vector<16x1xf32>
    %361 = math.rsqrt %360 : vector<16x1xf32>
    %362 = vector.broadcast %361 : vector<16x1xf32> to vector<16x32xf32>
    %363 = arith.mulf %358, %362 : vector<16x32xf32>
    %364 = vector.broadcast %207 : vector<1x32xf32> to vector<16x32xf32>
    %365 = arith.mulf %363, %364 : vector<16x32xf32>
    %366 = vector.broadcast %208 : vector<1x32xf32> to vector<16x32xf32>
    %367 = arith.addf %365, %366 : vector<16x32xf32>
    %c0_143 = arith.constant 0 : index
    %c0_144 = arith.constant 0 : index
    %368 = vector.load %arg4[%c0_143, %c0_144] : memref<2x16xf32, #tpu.memory_space<vmem>>, vector<2x16xf32>
    %cst_145 = arith.constant dense<0.000000e+00> : vector<2x32xf32>
    %369 = tpu.matmul %368, %367, %cst_145 {dimension_numbers = #tpu.dot_dimension_numbers<[1], [0], [0], [1], [0, 0, 1, 1], [], []>} : vector<2x16xf32>, vector<16x32xf32>, vector<2x32xf32> -> vector<2x32xf32>
    %c0_146 = arith.constant 0 : index
    %c0_147 = arith.constant 0 : index
    %370 = vector.load %arg29[%c0_146, %c0_147] : memref<2x32xf32, #tpu.memory_space<vmem>>, vector<2x32xf32>
    tpu.vector_store %arg29[%c0_146, %c0_147], %369 {strides = array<i32>} : memref<2x32xf32, #tpu.memory_space<vmem>>, vector<2x32xf32>,
    return
  }
}

</mosaic_0001>

<bundles_post_ra>
// kernel: sentence_transformer_forward.1
= control target key start
LH: loop header
LB: loop body
LE: loop exit
PB: predicated region body
PF: predicated region fallthrough
CT: control target
= control target key end

     0   :  { %s4257_s6 = smov 1   ;;  %s4258_s10 = smov 2   ;;  %s4786_s0 = inlined_call_operand.smem [shape: u32[30], index: -1, kind: input, shape index: {}] }
   0x1   :  { %s4309_s5 = sld [smem:[%s4786_s0]]   ;;  %s4259_s14 = smov 3  }
   0x2   :  { %s4314_s9 = sld [smem:[%s4786_s0 + %s4257_s6]]   ;;  %s4260_s18 = smov 4  }
   0x3   :  { %s4319_s13 = sld [smem:[%s4786_s0 + %s4258_s10]]   ;;  %s4261_s22 = smov 5  }
   0x4   :  { %s4324_s17 = sld [smem:[%s4786_s0 + %s4259_s14]]   ;;  %s4262_s26 = smov 6  }
   0x5   :  { %s4329_s21 = sld [smem:[%s4786_s0 + %s4260_s18]]   ;;  %s4263_s30 = smov 7  }
   0x6   :  { %s4334_s25 = sld [smem:[%s4786_s0 + %s4261_s22]]   ;;  %s4264_s4 = smov 8  }
   0x7   :  { %s4339_s29 = sld [smem:[%s4786_s0 + %s4262_s26]]   ;;  %s4265_s10 = smov 9  }
   0x8   :  { %s4344_s3 = sld [smem:[%s4786_s0 + %s4263_s30]]   ;;  %s4266_s15 = smov 10  }
   0x9   :  { %s4349_s8 = sld [smem:[%s4786_s0 + %s4264_s4]]   ;;  %s4267_s20 = smov 11  }
   0xa   :  { %s4354_s14 = sld [smem:[%s4786_s0 + %s4265_s10]]   ;;  %s4268_s26 = smov 12  }
   0xb   :  { %4791 = sst [smem:[#allocation5_spill]] %s4329_s21  ;;  %s4269_s1 = smov 13  }
   0xc   :  { %s4359_s19 = sld [smem:[%s4786_s0 + %s4266_s15]]   ;;  %s4270_s7 = smov 14  }
   0xd   :  { %s4364_s24 = sld [smem:[%s4786_s0 + %s4267_s20]]   ;;  %s4271_s15 = smov 15  }
   0xe   :  { %s4369_s30 = sld [smem:[%s4786_s0 + %s4268_s26]]   ;;  %s4272_s22 = smov 16  }
   0xf   :  { %s4374_s6 = sld [smem:[%s4786_s0 + %s4269_s1]]   ;;  %s4273_s28 = smov 17  }
  0x10   :  { %s4379_s12 = sld [smem:[%s4786_s0 + %s4270_s7]]   ;;  %s4274_s7 = smov 18  }
  0x11   :  { %s4384_s20 = sld [smem:[%s4786_s0 + %s4271_s15]]   ;;  %s4275_s15 = smov 19  }
  0x12   :  { %s4389_s27 = sld [smem:[%s4786_s0 + %s4272_s22]]   ;;  %s4276_s22 = smov 20  }
  0x13   :  { %s4394_s4 = sld [smem:[%s4786_s0 + %s4273_s28]]   ;;  %s4277_s28 = smov 21  }
  0x14   :  { %s4399_s21 = sld [smem:[%s4786_s0 + %s4274_s7]]   ;;  %s4278_s7 = smov 22  }
  0x17   :  { %4792 = sst [smem:[#allocation6_spill]] %s4384_s20 }
  0x18   :  { %4793 = sst [smem:[#allocation7_spill]] %s4389_s27 }
  0x19   :  { %4794 = sst [smem:[#allocation8_spill]] %s4394_s4 }
  0x1a   :  { %4795 = sst [smem:[#allocation9_spill]] %s4399_s21 }
  0x1b   :  { %s4404_s20 = sld [smem:[%s4786_s0 + %s4275_s15]]   ;;  %s4279_s15 = smov 23  }
  0x1c   :  { %s4409_s27 = sld [smem:[%s4786_s0 + %s4276_s22]]   ;;  %s4280_s22 = smov 24  }
  0x1d   :  { %s4414_s4 = sld [smem:[%s4786_s0 + %s4277_s28]]   ;;  %s4281_s28 = smov 25  }
  0x1e   :  { %s4419_s21 = sld [smem:[%s4786_s0 + %s4278_s7]]   ;;  %s4282_s7 = smov 26  }
  0x21   :  { %4796 = sst [smem:[#allocation10_spill]] %s4404_s20 }
  0x22   :  { %4797 = sst [smem:[#allocation11_spill]] %s4409_s27 }
  0x23   :  { %4798 = sst [smem:[#allocation12_spill]] %s4414_s4 }
  0x24   :  { %4799 = sst [smem:[#allocation13_spill]] %s4419_s21 }
  0x25   :  { %s4424_s20 = sld [smem:[%s4786_s0 + %s4279_s15]]   ;;  %s4283_s15 = smov 27  }
  0x26   :  { %s4429_s27 = sld [smem:[%s4786_s0 + %s4280_s22]]   ;;  %s4284_s22 = smov 28  }
  0x27   :  { %s4434_s4 = sld [smem:[%s4786_s0 + %s4281_s28]]   ;;  %s4285_s28 = smov 29  }
  0x28   :  { %s4439_s21 = sld [smem:[%s4786_s0 + %s4282_s7]]  }
  0x2b   :  { %4800 = sst [smem:[#allocation14_spill]] %s4424_s20 }
  0x2c   :  { %4801 = sst [smem:[#allocation15_spill]] %s4429_s27 }
  0x2d   :  { %4802 = sst [smem:[#allocation16_spill]] %s4434_s4 }
  0x2e   :  { %s4444_s20 = sld [smem:[%s4786_s0 + %s4283_s15]]  }
  0x2f   :  { %s4449_s27 = sld [smem:[%s4786_s0 + %s4284_s22]]  }
  0x30   :  { %s4454_s4 = sld [smem:[%s4786_s0 + %s4285_s28]]  }
  0x31   :  { %v123_v0 = vld [vmem:[%s4309_s5] sm:$0xff]  ;;  %vm127_vm0 = vcmask 261120   ;;  %v124_v1 = vld [vmem:[%s4309_s5 + $0x8] sm:$0xff] }
  0x32   :  { %64 = vsyncpa [#allocation3], 0  ;;  %v128_v2 = vsel %vm127_vm0, %v123_v0, 0.0  ;;  %v131_v3 = vsel %vm127_vm0, %v124_v1, 0.0  ;;  %v173_v14 = vld [vmem:[%s4334_s25] sm:$0xff]  ;;  %v174_v15 = vld [vmem:[%s4334_s25 + $0x8] sm:$0xff] }
  0x33   :  { %129 = vadd.xlane.f32.xlu0 %v128_v2  ;;  %v175_v16 = vld [vmem:[%s4334_s25 + $0x10] sm:$0xff]  ;;  %v3856_v17 = vpack.c.bf16 %v174_v15, %v173_v14  ;;  %v176_v18 = vld [vmem:[%s4334_s25 + $0x18] sm:$0xff]  ;;  %v3385_v27 = vld [vmem:[%s4314_s9] ss:$0 sm:$0xff]  ;;  %vm294_vm1 = vcmask 64512   ;;  %s4286_s0 = smov 88  }
  0x34   :  { %v3860_v19 = vpack.c.bf16 %v176_v18, %v175_v16  ;;  %v3386_v29 = vld [vmem:[%s4319_s13] ss:$0 sm:$0xff]  ;;  %s4287_s5 = smov 96   ;;  %s4288_s9 = smov 120   ;;  %vm4503_vm2 = vmpackc.low %vm294_vm1, %vm294_vm1  ;;  %v4526_v60 = vld [vmem:[%s4324_s17 + $0x8] sm:$0xff]  ;;  %vm382_vm3 = vcmask 130048  }
  0x35   :  { %3857 = vmatprep.subr.bf16.mxu1 %v3856_v17  ;;  %v3387_v36 = vld [vmem:[%s4339_s29] ss:$0 sm:$0xff]  ;;  %s4289_s13 = smov 80   ;;  %s4290_s25 = smov 112   ;;  %vm1595_vm4 = vcmask 523264   ;;  %vm4298_vm5 = vmmov 0  }
  0x36   :  { %3859 = vmatpush3.bf16.msra.mxu1 %v3856_v17  ;;  %v4529_v63 = vld [vmem:[%s4324_s17] sm:$0xff]  ;;  %s4291_s29 = smov 64   ;;  %s4292_s7 = smov 72   ;;  %vm3340_vm6 = vcmask 254976  }
  0x37   :  { %132 = vadd.xlane.f32.xlu0 %v131_v3  ;;  %3861 = vmatprep.subr.bf16.mxu1 %v3860_v19  ;;  %s4293_s10 = smov 104   ;;  %s4294_s11 = smov 56  }
  0x38   :  { %s4295_s15 = smov 48   ;;  %s4296_s16 = smov 40  }
  0x39   :  { %s4814_s18 = sld [smem:[#allocation16_spill]]  ;;  %s4815_s22 = sld [smem:[#allocation15_spill]] }
  0x3a   :  { %3863 = vmatpush3.bf16.msra.mxu1 %v3860_v19  ;;  %s4300_s23 = smov [#allocation2]  }
  0x3b   :  { %s3348_s26 = sshll.u32 %s4300_s23, 4  ;;  %s3349_s26 = int_to_ptr.vmem [resolvable:$true] %s3348_s26 }
  0x3c   :  { %p4238_p1 = scmp.lt.s32.totalorder %s3349_s26, %s3349_s26 }
  0xc0   :  { %v130_v4 = vpop.xlane.xlu0 %129 }
  0xc1   :  { %v135_v5 = vmul.f32 0.03125, %v130_v4 }
  0xc3   :  { %v137_v6 = vsub.f32 %v123_v0, %v135_v5 }
  0xc4   :  { %v133_v7 = vpop.xlane.xlu0 %132 }
  0xc5   :  { %v136_v8 = vmul.f32 0.03125, %v133_v7  ;;  %v139_v9 = vmul.f32 %v137_v6, %v137_v6 }
  0xc7   :  { %v138_v10 = vsub.f32 %v124_v1, %v136_v8  ;;  %v141_v11 = vsel %vm127_vm0, %v139_v9, 0.0 }
  0xc8   :  { %142 = vadd.xlane.f32.xlu1 %v141_v11 }
  0xc9   :  { %v140_v12 = vmul.f32 %v138_v10, %v138_v10 }
  0xcb   :  { %v144_v13 = vsel %vm127_vm0, %v140_v12, 0.0 }
  0xcc   :  { %145 = vadd.xlane.f32.xlu1 %v144_v13 }
 0x155   :  { %v143_v20 = vpop.xlane.xlu1 %142 }
 0x156   :  { %v147_v21 = vmul.f32 0.03125, %v143_v20 }
 0x158   :  { %v149_v22 = vadd.f32 1e-12, %v147_v21 }
 0x159   :  { %v146_v23 = vpop.xlane.xlu1 %145 }
 0x15a   :  { %4139 = vrsqrt.f32 %v149_v22  ;;  %v148_v24 = vmul.f32 0.03125, %v146_v23 }
 0x15c   :  { %v150_v25 = vadd.f32 1e-12, %v148_v24 }
 0x15e   :  { %4141 = vrsqrt.f32 %v150_v25 }
 0x164   :  { %v4140_v26 = vpop.eup %4139 }
 0x165   :  { %v153_v28 = vmul.f32 %v4140_v26, %v137_v6 }
 0x167   :  { %v161_v30 = vmul.f32 %v3385_v27, %v153_v28 }
 0x168   :  { %v4142_v31 = vpop.eup %4141 }
 0x169   :  { %v154_v32 = vmul.f32 %v4142_v31, %v138_v10  ;;  %v4468_v33 = vadd.f32 %v3386_v29, %v161_v30 }
 0x16b   :  { %v162_v34 = vmul.f32 %v3385_v27, %v154_v32  ;;  %3623 = vmatprep.mubr.msk.f32.mxu1 %vm127_vm0, %v4468_v33 }
 0x16d   :  { %v4472_v35 = vadd.f32 %v3386_v29, %v162_v34 }
 0x16f   :  { %3624 = vmatmul.mubr.msk.f32.vlgmr.msra.gmra.mrb[0].mxu1 %vm127_vm0, %v4472_v35 }
 0x242   :  { %v3625_v37 = vpop.f32.mrb[0].mxu1 }
 0x243   :  { %v4477_v38 = vadd.f32 %v3625_v37, %v3387_v36  ;;  %v279_v39 = vpop.f32.mrb[1].mxu1 }
 0x244   :  { %v4479_v40 = vadd.f32 %v3387_v36, %v279_v39 }
 0x246   :  { %3630 = vmatprep.mubr.msk.f32.mxu1 %vm294_vm1, %v4479_v40  ;;  %v4485_v41 = vpack.i.bf16 %v4477_v38, %v4479_v40 }
 0x248   :  { %4065 = vrot.lane.b32.xlu1 %v4485_v41, %s4286_s0  ;;  %4060 = vrot.lane.b32.xlu0 %v4485_v41, %s4287_s5 }
 0x24c   :  { %492 = vrot.lane.b32.xlu1 %v4479_v40, %s4288_s9  ;;  %4070 = vrot.lane.b32.xlu0 %v4485_v41, %s4289_s13 }
 0x250   :  { %494 = vrot.lane.b32.xlu1 %v4477_v38, %s4288_s9  ;;  %860 = vrot.lane.b32.xlu0 %v4477_v38, %s4290_s25 }
 0x254   :  { %858 = vrot.lane.b32.xlu1 %v4479_v40, %s4290_s25 }
 0x2ba   :  { %v4066_v42 = vpop.permute.xlu1 %4065  ;;  %v4061_v43 = vpop.permute.xlu0 %4060 }
 0x2bb   :  { %v4068_v44 = vunpack.i.h.bf16 %v4066_v42  ;;  %v4067_v45 = vunpack.i.l.bf16 %v4066_v42  ;;  %v4063_v46 = vunpack.i.h.bf16 %v4061_v43  ;;  %v4062_v47 = vunpack.i.l.bf16 %v4061_v43 }
 0x2bd   :  { %v3864_v49 = vpack.c.bf16 %v4063_v46, %v4062_v47  ;;  %v3874_v50 = vpack.c.bf16 %v4068_v44, %v4067_v45 }
 0x2be   :  { %v4071_v51 = vpop.permute.xlu0 %4070  ;;  %v493_v52 = vpop.permute.xlu1 %492 }
 0x2bf   :  { %3866 = vmatprep.subr.msk.bf16.mxu1 %vm4503_vm2, %v3864_v49  ;;  %v4073_v53 = vunpack.i.h.bf16 %v4071_v51  ;;  %v4072_v54 = vunpack.i.l.bf16 %v4071_v51 }
 0x2c0   :  { %3869 = vmatpush3.bf16.xpose.msk.msra.mxu1 %vm4503_vm2, %v3864_v49 }
 0x2c1   :  { %3876 = vmatprep.subr.msk.bf16.mxu1 %vm4503_vm2, %v3874_v50  ;;  %v3884_v55 = vpack.c.bf16 %v4073_v53, %v4072_v54 }
 0x2c2   :  { %v495_v56 = vpop.permute.xlu1 %494  ;;  %v861_v58 = vpop.permute.xlu0 %860 }
 0x2c6   :  { %v859_v57 = vpop.permute.xlu1 %858 }
 0x2c7   :  { %3631 = vmatmul.mubr.msk.f32.vlgmr.msra.gmra.mrb[2].mxu1 %vm294_vm1, %v4477_v38 }
 0x2c8   :  { %3879 = vmatpush3.bf16.xpose.msk.msra.mxu1 %vm4503_vm2, %v3874_v50  ;;  %3644 = vmatprep.mubr.msk.f32.mxu1 %vm294_vm1, %v493_v52 }
 0x2c9   :  { %3886 = vmatprep.subr.msk.bf16.mxu1 %vm4503_vm2, %v3884_v55 }
 0x2cf   :  { %3645 = vmatmul.mubr.msk.f32.vlgmr.msra.gmra.mrb[4].mxu1 %vm294_vm1, %v495_v56 }
 0x2d0   :  { %3889 = vmatpush3.bf16.xpose.msk.msra.mxu1 %vm4503_vm2, %v3884_v55  ;;  %3668 = vmatprep.mubr.msk.f32.mxu1 %vm294_vm1, %v859_v57 }
 0x2d7   :  { %3669 = vmatmul.mubr.msk.f32.vlgmr.msra.gmra.mrb[6].mxu1 %vm294_vm1, %v861_v58 }
 0x39a   :  { %v3632_v59 = vpop.f32.mrb[2].mxu1 }
 0x39b   :  { %v379_v61 = vmul.f32 0.35355338, %v3632_v59  ;;  %v369_v62 = vpop.f32.mrb[3].mxu1 }
 0x39c   :  { %v378_v0 = vmul.f32 0.35355338, %v369_v62 }
 0x39d   :  { %v381_v1 = vadd.f32 %v379_v61, %v4526_v60 }
 0x39e   :  { %v380_v2 = vadd.f32 %v378_v0, %v4529_v63 }
 0x39f   :  { %v386_v3 = vsel %vm382_vm3, %v381_v1, -inf }
 0x3a0   :  { %387 = vmax.xlane.f32.xlu0 %v386_v3  ;;  %v383_v4 = vsel %vm382_vm3, %v380_v2, -inf }
 0x3a1   :  { %384 = vmax.xlane.f32.xlu1 %v383_v4 }
 0x3a2   :  { %v3646_v5 = vpop.f32.mrb[4].mxu1 }
 0x3a3   :  { %v574_v6 = vpop.f32.mrb[5].mxu1  ;;  %v584_v7 = vmul.f32 0.35355338, %v3646_v5 }
 0x3a4   :  { %v583_v8 = vmul.f32 0.35355338, %v574_v6 }
 0x3a5   :  { %v586_v11 = vadd.f32 %v584_v7, %v4526_v60 }
 0x3a6   :  { %v585_v9 = vadd.f32 %v583_v8, %v4529_v63 }
 0x3a7   :  { %v590_v14 = vsel %vm382_vm3, %v586_v11, -inf }
 0x3a8   :  { %v587_v10 = vsel %vm382_vm3, %v585_v9, -inf }
 0x3a9   :  { %588 = vmax.xlane.f32.xlu0 %v587_v10 }
 0x3aa   :  { %v3670_v12 = vpop.f32.mrb[6].mxu1 }
 0x3ab   :  { %v940_v13 = vpop.f32.mrb[7].mxu1  ;;  %v950_v42 = vmul.f32 0.35355338, %v3670_v12 }
 0x3ac   :  { %v949_v37 = vmul.f32 0.35355338, %v940_v13 }
 0x3ad   :  { %591 = vmax.xlane.f32.xlu0 %v590_v14  ;;  %v952_v44 = vadd.f32 %v950_v42, %v4526_v60 }
 0x3ae   :  { %v951_v39 = vadd.f32 %v949_v37, %v4529_v63 }
 0x3af   :  { %v956_v45 = vsel %vm382_vm3, %v952_v44, -inf }
 0x3b0   :  { %v953_v43 = vsel %vm382_vm3, %v951_v39, -inf }
 0x42d   :  { %v388_v15 = vpop.xlane.xlu0 %387 }
 0x42e   :  { %v390_v16 = vsub.f32 %v381_v1, %v388_v15  ;;  %v385_v17 = vpop.xlane.xlu1 %384 }
 0x42f   :  { %v389_v18 = vsub.f32 %v380_v2, %v385_v17 }
 0x430   :  { %v393_v19 = vmul.f32 1.442695, %v390_v16 }
 0x431   :  { %v391_v20 = vmul.f32 1.442695, %v389_v18 }
 0x432   :  { %4143 = vpow2.f32 %v393_v19  ;;  %v179_v19 = vld [vmem:[%s4344_s3 + $0x8] sm:$0xff] }
 0x433   :  { %4145 = vpow2.f32 %v391_v20  ;;  %v178_v20 = vld [vmem:[%s4344_s3] sm:$0xff] }
 0x436   :  { %v589_v21 = vpop.xlane.xlu0 %588 }
 0x437   :  { %v593_v22 = vsub.f32 %v585_v9, %v589_v21 }
 0x439   :  { %v595_v23 = vmul.f32 1.442695, %v593_v22 }
 0x43a   :  { %v592_v24 = vpop.xlane.xlu0 %591 }
 0x43b   :  { %4147 = vpow2.f32 %v595_v23  ;;  %v594_v25 = vsub.f32 %v586_v11, %v592_v24 }
 0x43c   :  { %v4144_v26 = vpop.eup %4143 }
 0x43d   :  { %v4146_v27 = vpop.eup %4145  ;;  %v597_v28 = vmul.f32 1.442695, %v594_v25  ;;  %v398_v29 = vsel %vm382_vm3, %v4144_v26, 0.0 }
 0x43e   :  { %399 = vadd.xlane.f32.xlu0 %v398_v29  ;;  %v395_v30 = vsel %vm382_vm3, %v4146_v27, 0.0 }
 0x43f   :  { %4149 = vpow2.f32 %v597_v28  ;;  %396 = vadd.xlane.f32.xlu1 %v395_v30 }
 0x445   :  { %v4148_v31 = vpop.eup %4147 }
 0x446   :  { %v599_v32 = vsel %vm382_vm3, %v4148_v31, 0.0 }
 0x447   :  { %600 = vadd.xlane.f32.xlu1 %v599_v32 }
 0x449   :  { %v4150_v34 = vpop.eup %4149 }
 0x44a   :  { %v602_v36 = vsel %vm382_vm3, %v4150_v34, 0.0 }
 0x44b   :  { %603 = vadd.xlane.f32.xlu0 %v602_v36 }
 0x458   :  { %4075 = vrot.lane.b32.xlu1 %v4485_v41, %s4291_s29 }
 0x45c   :  { %4085 = vrot.lane.b32.xlu1 %v4485_v41, %s4292_s7 }
 0x460   :  { %1145 = vrot.lane.b32.xlu1 %v4479_v40, %s4293_s10 }
 0x461   :  { %4080 = vrot.lane.b32.xlu0 %v4485_v41, %s4294_s11 }
 0x464   :  { %1147 = vrot.lane.b32.xlu1 %v4477_v38, %s4293_s10 }
 0x480   :  { %954 = vmax.xlane.f32.xlu0 %v953_v43 }
 0x488   :  { %957 = vmax.xlane.f32.xlu1 %v956_v45 }
 0x4cb   :  { %v400_v46 = vpop.xlane.xlu0 %399 }
 0x4cc   :  { %v397_v40 = vpop.xlane.xlu1 %396 }
 0x4cd   :  { %4151 = vrcp.f32 %v397_v40 }
 0x4ce   :  { %4153 = vrcp.f32 %v400_v46 }
 0x4d4   :  { %v601_v47 = vpop.xlane.xlu1 %600 }
 0x4d5   :  { %4155 = vrcp.f32 %v601_v47  ;;  %v180_v47 = vld [vmem:[%s4344_s3 + $0x10] sm:$0xff] }
 0x4d7   :  { %v4152_v49 = vpop.eup %4151 }
 0x4d8   :  { %v604_v38 = vpop.xlane.xlu0 %603  ;;  %v4076_v50 = vpop.permute.xlu1 %4075  ;;  %v403_v51 = vmul.f32 %v4152_v49, %v4146_v27 }
 0x4d9   :  { %4157 = vrcp.f32 %v604_v38  ;;  %v4078_v52 = vunpack.i.h.bf16 %v4076_v50  ;;  %v4077_v53 = vunpack.i.l.bf16 %v4076_v50  ;;  %v4154_v55 = vpop.eup %4153 }
 0x4da   :  { %3637 = vmatprep.mubr.msk.f32.mxu0 %vm382_vm3, %v403_v51  ;;  %v404_v3 = vmul.f32 %v4154_v55, %v4144_v26 }
 0x4db   :  { %v3870_v54 = vpack.c.bf16 %v4078_v52, %v4077_v53 }
 0x4dc   :  { %v4081_v56 = vpop.permute.xlu0 %4080  ;;  %v4086_v57 = vpop.permute.xlu1 %4085 }
 0x4dd   :  { %v4083_v58 = vunpack.i.h.bf16 %v4081_v56  ;;  %v4082_v59 = vunpack.i.l.bf16 %v4081_v56  ;;  %v4088_v61 = vunpack.i.h.bf16 %v4086_v57  ;;  %v4087_v62 = vunpack.i.l.bf16 %v4086_v57  ;;  %3871 = vmatprep.subr.bf16.mxu0 %v3870_v54 }
 0x4de   :  { %3873 = vmatpush3.bf16.msra.mxu0 %v3870_v54 }
 0x4df   :  { %v4156_v0 = vpop.eup %4155  ;;  %v3880_v1 = vpack.c.bf16 %v4083_v58, %v4082_v59  ;;  %v3894_v2 = vpack.c.bf16 %v4088_v61, %v4087_v62 }
 0x4e0   :  { %v1146_v4 = vpop.permute.xlu1 %1145  ;;  %v607_v5 = vmul.f32 %v4156_v0, %v4148_v31 }
 0x4e1   :  { %3638 = vmatmul.mubr.msk.f32.vlgmr.msra.gmra.mrb[0].mxu0 %vm382_vm3, %v404_v3  ;;  %3881 = vmatprep.subr.bf16.mxu0 %v3880_v1 }
 0x4e2   :  { %3896 = vmatprep.subr.msk.bf16.mxu1 %vm4503_vm2, %v3894_v2  ;;  %3687 = vmatprep.mubr.msk.f32.mxu1 %vm294_vm1, %v1146_v4  ;;  %v181_v4 = vld [vmem:[%s4344_s3 + $0x18] sm:$0xff]  ;;  %s4805_s3 = sld [smem:[#allocation8_spill]] }
 0x4e3   :  { %v4158_v6 = vpop.eup %4157  ;;  %3883 = vmatpush3.bf16.msra.mxu0 %v3880_v1  ;;  %3651 = vmatprep.mubr.msk.f32.mxu0 %vm382_vm3, %v607_v5 }
 0x4e4   :  { %v608_v7 = vmul.f32 %v4158_v6, %v4150_v34  ;;  %3899 = vmatpush3.bf16.xpose.msk.msra.mxu1 %vm4503_vm2, %v3894_v2  ;;  %v1148_v8 = vpop.permute.xlu1 %1147  ;;  %3654 = vmatprep.subr.mxu0 %v179_v19 }
 0x4e6   :  { %3652 = vmatmul.mubr.msk.f32.vlgmr.msra.gmra.mrb[2].mxu0 %vm382_vm3, %v608_v7 }
 0x4e7   :  { %3655 = vmatpush3.msra.mxu0 %v179_v19 }
 0x4e8   :  { %3659 = vmatprep.subr.mxu0 %v178_v20 }
 0x4eb   :  { %3688 = vmatmul.mubr.msk.f32.vlgmr.msra.gmra.mrb[8].mxu1 %vm294_vm1, %v1148_v8 }
 0x50d   :  { %v955_v9 = vpop.xlane.xlu0 %954 }
 0x50e   :  { %v959_v10 = vsub.f32 %v951_v39, %v955_v9 }
 0x510   :  { %v961_v13 = vmul.f32 1.442695, %v959_v10  ;;  %v3422_v10 = vld [vmem:[%s4349_s8] ss:$0 sm:$0xff]  ;;  %s4806_s8 = sld [smem:[#allocation6_spill]] }
 0x515   :  { %v958_v11 = vpop.xlane.xlu1 %957 }
 0x516   :  { %v960_v12 = vsub.f32 %v952_v44, %v958_v11 }
 0x518   :  { %v963_v14 = vmul.f32 1.442695, %v960_v12 }
 0x51a   :  { %4159 = vpow2.f32 %v963_v14 }
 0x51b   :  { %4161 = vpow2.f32 %v961_v13 }
 0x524   :  { %v4160_v15 = vpop.eup %4159 }
 0x525   :  { %v968_v16 = vsel %vm382_vm3, %v4160_v15, 0.0  ;;  %v4162_v17 = vpop.eup %4161 }
 0x526   :  { %969 = vadd.xlane.f32.xlu0 %v968_v16  ;;  %v965_v18 = vsel %vm382_vm3, %v4162_v17, 0.0 }
 0x52a   :  { %966 = vadd.xlane.f32.xlu0 %v965_v18 }
 0x540   :  { %4090 = vrot.lane.b32.xlu0 %v4485_v41, %s4295_s15 }
 0x5b3   :  { %v970_v21 = vpop.xlane.xlu0 %969 }
 0x5b4   :  { %v3639_v22 = vpop.f32.mrb[0].mxu0 }
 0x5b5   :  { %v483_v23 = vpop.f32.mrb[1].mxu0 }
 0x5b7   :  { %v967_v24 = vpop.xlane.xlu0 %966 }
 0x5b8   :  { %4163 = vrcp.f32 %v967_v24 }
 0x5b9   :  { %4165 = vrcp.f32 %v970_v21  ;;  %v3653_v25 = vpop.f32.mrb[2].mxu0 }
 0x5ba   :  { %v687_v26 = vpop.f32.mrb[3].mxu0 }
 0x5bb   :  { %v4091_v27 = vpop.permute.xlu0 %4090  ;;  %3656 = vmatprep.mubr.msk.f32.mxu0 %vm294_vm1, %v687_v26 }
 0x5bc   :  { %v4093_v28 = vunpack.i.h.bf16 %v4091_v27  ;;  %v4092_v29 = vunpack.i.l.bf16 %v4091_v27  ;;  %3657 = vmatmul.mubr.msk.f32.vlgmr.msra.gmra.mrb[4].mxu0 %vm294_vm1, %v3653_v25  ;;  %v185_v27 = vld [vmem:[%s4364_s24] sm:$0xff] }
 0x5bd   :  { %3661 = vmatprep.mubr.msk.f32.mxu0 %vm294_vm1, %v483_v23  ;;  %3660 = vmatpush3.msra.mxu0 %v178_v20 }
 0x5be   :  { %v3890_v30 = vpack.c.bf16 %v4093_v28, %v4092_v29  ;;  %v3689_v31 = vpop.f32.mrb[8].mxu1  ;;  %v186_v28 = vld [vmem:[%s4364_s24 + $0x8] sm:$0xff] }
 0x5bf   :  { %v1227_v32 = vpop.f32.mrb[9].mxu1  ;;  %v1237_v34 = vmul.f32 0.35355338, %v3689_v31  ;;  %v3904_v29 = vpack.c.bf16 %v186_v28, %v185_v27  ;;  %v188_v31 = vld [vmem:[%s4364_s24 + $0x18] sm:$0xff] }
 0x5c0   :  { %v1236_v36 = vmul.f32 0.35355338, %v1227_v32  ;;  %3891 = vmatprep.subr.bf16.mxu0 %v3890_v30 }
 0x5c1   :  { %v1239_v45 = vadd.f32 %v1237_v34, %v4526_v60  ;;  %3905 = vmatprep.subr.bf16.mxu1 %v3904_v29 }
 0x5c2   :  { %v4164_v37 = vpop.eup %4163  ;;  %v1238_v39 = vadd.f32 %v1236_v36, %v4529_v63  ;;  %3907 = vmatpush3.bf16.msra.mxu1 %v3904_v29 }
 0x5c3   :  { %v4166_v42 = vpop.eup %4165  ;;  %v973_v43 = vmul.f32 %v4164_v37, %v4162_v17  ;;  %v1243_v46 = vsel %vm382_vm3, %v1239_v45, -inf }
 0x5c4   :  { %v1240_v44 = vsel %vm382_vm3, %v1238_v39, -inf  ;;  %3662 = vmatmul.mubr.msk.f32.vlgmr.msra.gmra.mrb[4].mxu0 %vm294_vm1, %v3639_v22  ;;  %v974_v40 = vmul.f32 %v4166_v42, %v4160_v15 }
 0x5c5   :  { %1241 = vmax.xlane.f32.xlu1 %v1240_v44  ;;  %3893 = vmatpush3.bf16.msra.mxu0 %v3890_v30  ;;  %v187_v30 = vld [vmem:[%s4364_s24 + $0x10] sm:$0xff]  ;;  %s4809_s24 = sld [smem:[#allocation10_spill]] }
 0x5c6   :  { %3675 = vmatprep.mubr.msk.f32.mxu0 %vm382_vm3, %v973_v43  ;;  %3678 = vmatprep.subr.mxu0 %v180_v47  ;;  %v3908_v32 = vpack.c.bf16 %v188_v31, %v187_v30 }
 0x5c8   :  { %3676 = vmatmul.mubr.msk.f32.vlgmr.msra.gmra.mrb[6].mxu0 %vm382_vm3, %v974_v40  ;;  %3909 = vmatprep.subr.bf16.mxu1 %v3908_v32 }
 0x5c9   :  { %1244 = vmax.xlane.f32.xlu1 %v1243_v46  ;;  %3679 = vmatpush3.msra.mxu0 %v180_v47  ;;  %v3424_v46 = vld [vmem:[%s4359_s19] ss:$0 sm:$0xff]  ;;  %s4808_s19 = sld [smem:[#allocation9_spill]] }
 0x5ca   :  { %3911 = vmatpush3.bf16.msra.mxu1 %v3908_v32 }
 0x652   :  { %v1242_v49 = vpop.xlane.xlu1 %1241 }
 0x653   :  { %v1246_v38 = vsub.f32 %v1238_v39, %v1242_v49 }
 0x655   :  { %v1248_v52 = vmul.f32 1.442695, %v1246_v38 }
 0x656   :  { %v1245_v50 = vpop.xlane.xlu1 %1244 }
 0x657   :  { %v1247_v51 = vsub.f32 %v1239_v45, %v1245_v50  ;;  %v3423_v45 = vld [vmem:[%s4354_s14] ss:$0 sm:$0xff]  ;;  %s4807_s14 = sld [smem:[#allocation7_spill]] }
 0x659   :  { %v1250_v53 = vmul.f32 1.442695, %v1247_v51 }
 0x65b   :  { %4167 = vpow2.f32 %v1250_v53  ;;  %v190_v53 = vld [vmem:[%s4374_s6] sm:$0xff] }
 0x65c   :  { %4169 = vpow2.f32 %v1248_v52 }
 0x665   :  { %v4168_v54 = vpop.eup %4167 }
 0x666   :  { %v1255_v55 = vsel %vm382_vm3, %v4168_v54, 0.0  ;;  %v4170_v56 = vpop.eup %4169 }
 0x667   :  { %1256 = vadd.xlane.f32.xlu1 %v1255_v55  ;;  %v1252_v57 = vsel %vm382_vm3, %v4170_v56, 0.0 }
 0x66b   :  { %1253 = vadd.xlane.f32.xlu1 %v1252_v57  ;;  %v193_v57 = vld [vmem:[%s4374_s6 + $0x18] sm:$0xff] }
 0x67c   :  { %4095 = vrot.lane.b32.xlu1 %v4485_v41, %s4296_s16 }
 0x69b   :  { %v3677_v58 = vpop.f32.mrb[6].mxu0 }
 0x69c   :  { %v1053_v59 = vpop.f32.mrb[7].mxu0 }
 0x69d   :  { %3680 = vmatprep.mubr.msk.f32.mxu0 %vm294_vm1, %v1053_v59  ;;  %v194_v59 = vld [vmem:[%s4374_s6 + $0x20] sm:$0xff] }
 0x69e   :  { %3681 = vmatmul.mubr.msk.f32.vlgmr.msra.gmra.mrb[4].mxu0 %vm294_vm1, %v3677_v58 }
 0x6f4   :  { %v1257_v61 = vpop.xlane.xlu1 %1256 }
 0x6f5   :  { %4171 = vrcp.f32 %v1257_v61  ;;  %v195_v61 = vld [vmem:[%s4374_s6 + $0x28] sm:$0xff] }
 0x6f8   :  { %v1254_v62 = vpop.xlane.xlu1 %1253 }
 0x6f9   :  { %4173 = vrcp.f32 %v1254_v62  ;;  %v3920_v62 = vpack.c.bf16 %v195_v61, %v194_v59  ;;  %v3431_v59 = vld [vmem:[%s4806_s8] ss:$0 sm:$0xff] }
 0x6fc   :  { %v4096_v0 = vpop.permute.xlu1 %4095 }
 0x6fd   :  { %v4098_v1 = vunpack.i.h.bf16 %v4096_v0  ;;  %v4097_v2 = vunpack.i.l.bf16 %v4096_v0  ;;  %v196_v0 = vld [vmem:[%s4374_s6 + $0x30] sm:$0xff] }
 0x6ff   :  { %v3900_v3 = vpack.c.bf16 %v4098_v1, %v4097_v2  ;;  %v4172_v5 = vpop.eup %4171  ;;  %v197_v1 = vld [vmem:[%s4374_s6 + $0x38] sm:$0xff] }
 0x700   :  { %v1261_v7 = vmul.f32 %v4172_v5, %v4168_v54  ;;  %v191_v54 = vld [vmem:[%s4374_s6 + $0x8] sm:$0xff]  ;;  %v3924_v2 = vpack.c.bf16 %v197_v1, %v196_v0 }
 0x701   :  { %3901 = vmatprep.subr.bf16.mxu0 %v3900_v3  ;;  %v3912_v55 = vpack.c.bf16 %v191_v54, %v190_v53 }
 0x702   :  { %3903 = vmatpush3.bf16.msra.mxu0 %v3900_v3  ;;  %v3425_v3 = vld [vmem:[%s4369_s30] ss:$0 sm:$0xff]  ;;  %s4811_s30 = sld [smem:[#allocation14_spill]] }
 0x703   :  { %v4174_v41 = vpop.eup %4173  ;;  %3697 = vmatprep.subr.mxu0 %v181_v4 }
 0x704   :  { %v1260_v6 = vmul.f32 %v4174_v41, %v4170_v56  ;;  %v192_v56 = vld [vmem:[%s4374_s6 + $0x10] sm:$0xff]  ;;  %s4812_s6 = sld [smem:[#allocation12_spill]] }
 0x705   :  { %v3916_v58 = vpack.c.bf16 %v193_v57, %v192_v56 }
 0x706   :  { %3694 = vmatprep.mubr.msk.f32.mxu0 %vm382_vm3, %v1260_v6 }
 0x707   :  { %3695 = vmatmul.mubr.msk.f32.vlgmr.msra.gmra.mrb[8].mxu0 %vm382_vm3, %v1261_v7 }
 0x708   :  { %3698 = vmatpush3.msra.mxu0 %v181_v4 }
 0x709   :  { %3913 = vmatprep.subr.bf16.mxu0 %v3912_v55 }
 0x7da   :  { %v3696_v8 = vpop.f32.mrb[8].mxu0 }
 0x7db   :  { %v1340_v9 = vpop.f32.mrb[9].mxu0 }
 0x7dc   :  { %3699 = vmatprep.mubr.msk.f32.mxu0 %vm294_vm1, %v1340_v9 }
 0x7dd   :  { %3700 = vmatmul.mubr.msk.f32.vlgmr.msra.gmra.mrb[4].mxu0 %vm294_vm1, %v3696_v8 }
 0x7de   :  { %3915 = vmatpush3.bf16.msra.mxu0 %v3912_v55 }
 0x7df   :  { %3917 = vmatprep.subr.bf16.mxu0 %v3916_v58 }
 0x7e2   :  { %3919 = vmatpush3.bf16.msra.mxu0 %v3916_v58 }
 0x7e3   :  { %3921 = vmatprep.subr.bf16.mxu0 %v3920_v62 }
 0x7e6   :  { %3923 = vmatpush3.bf16.msra.mxu0 %v3920_v62  ;;  %v3432_v62 = vld [vmem:[%s4807_s14] ss:$0 sm:$0xff] }
 0x7e7   :  { %3925 = vmatprep.subr.bf16.mxu0 %v3924_v2 }
 0x7ea   :  { %3927 = vmatpush3.bf16.msra.mxu0 %v3924_v2 }
 0x8b0   :  { %v3701_v11 = vpop.f32.mrb[4].mxu0 }
 0x8b1   :  { %v1439_v12 = vadd.f32 %v3701_v11, %v3422_v10  ;;  %v1421_v13 = vpop.f32.mrb[5].mxu0 }
 0x8b2   :  { %v1438_v14 = vadd.f32 %v3422_v10, %v1421_v13 }
 0x8b3   :  { %v1441_v15 = vadd.f32 %v1439_v12, %v4472_v35 }
 0x8b4   :  { %v1440_v16 = vadd.f32 %v1438_v14, %v4468_v33 }
 0x8b5   :  { %v1445_v17 = vsel %vm127_vm0, %v1441_v15, 0.0 }
 0x8b6   :  { %1446 = vadd.xlane.f32.xlu1 %v1445_v17  ;;  %v1442_v18 = vsel %vm127_vm0, %v1440_v16, 0.0 }
 0x8b7   :  { %1443 = vadd.xlane.f32.xlu0 %v1442_v18 }
 0x943   :  { %v1447_v19 = vpop.xlane.xlu1 %1446 }
 0x944   :  { %v1449_v20 = vmul.f32 0.03125, %v1447_v19  ;;  %v1444_v21 = vpop.xlane.xlu0 %1443 }
 0x945   :  { %v1448_v22 = vmul.f32 0.03125, %v1444_v21 }
 0x946   :  { %v1451_v23 = vsub.f32 %v1441_v15, %v1449_v20 }
 0x947   :  { %v1450_v24 = vsub.f32 %v1440_v16, %v1448_v22 }
 0x948   :  { %v1453_v33 = vmul.f32 %v1451_v23, %v1451_v23 }
 0x949   :  { %v1452_v25 = vmul.f32 %v1450_v24, %v1450_v24 }
 0x94a   :  { %v1457_v26 = vsel %vm127_vm0, %v1453_v33, 0.0 }
 0x94b   :  { %v1454_v35 = vsel %vm127_vm0, %v1452_v25, 0.0  ;;  %v3428_v25 = vld [vmem:[%s4379_s12] ss:$0 sm:$0xff]  ;;  %s4813_s12 = sld [smem:[#allocation13_spill]] }
 0x94c   :  { %1455 = vadd.xlane.f32.xlu0 %v1454_v35 }
 0x950   :  { %1458 = vadd.xlane.f32.xlu0 %v1457_v26 }
 0x9d9   :  { %v1456_v34 = vpop.xlane.xlu0 %1455 }
 0x9da   :  { %v1460_v36 = vmul.f32 0.03125, %v1456_v34 }
 0x9dc   :  { %v1462_v37 = vadd.f32 1e-12, %v1460_v36 }
 0x9dd   :  { %v1459_v39 = vpop.xlane.xlu0 %1458 }
 0x9de   :  { %4175 = vrsqrt.f32 %v1462_v37  ;;  %v1461_v42 = vmul.f32 0.03125, %v1459_v39 }
 0x9e0   :  { %v1463_v43 = vadd.f32 1e-12, %v1461_v42 }
 0x9e2   :  { %4177 = vrsqrt.f32 %v1463_v43 }
 0x9e8   :  { %v4176_v44 = vpop.eup %4175 }
 0x9e9   :  { %v1466_v40 = vmul.f32 %v4176_v44, %v1450_v24 }
 0x9eb   :  { %v1474_v47 = vmul.f32 %v3423_v45, %v1466_v40 }
 0x9ec   :  { %v4178_v49 = vpop.eup %4177 }
 0x9ed   :  { %v1467_v38 = vmul.f32 %v4178_v49, %v1451_v23  ;;  %v1482_v50 = vadd.f32 %v3424_v46, %v1474_v47  ;;  %v1722_v47 = vld [vmem:[%s4805_s3 + $0x8] sm:$0xff] }
 0x9ef   :  { %v1475_v51 = vmul.f32 %v3423_v45, %v1467_v38  ;;  %3710 = vmatprep.mubr.msk.f32.mxu1 %vm127_vm0, %v1482_v50  ;;  %v1723_v38 = vld [vmem:[%s4805_s3 + $0x10] sm:$0xff] }
 0x9f1   :  { %v1483_v52 = vadd.f32 %v3424_v46, %v1475_v51  ;;  %v1721_v46 = vld [vmem:[%s4805_s3] sm:$0xff] }
 0x9f2   :  { %v3928_v49 = vpack.c.bf16 %v1722_v47, %v1721_v46 }
 0x9f3   :  { %3711 = vmatmul.mubr.msk.f32.vlgmr.msra.gmra.mrb[10].mxu1 %vm127_vm0, %v1483_v52 }
 0x9f4   :  { %3929 = vmatprep.subr.bf16.mxu1 %v3928_v49 }
 0x9f5   :  { %3931 = vmatpush3.bf16.msra.mxu1 %v3928_v49 }
 0xac6   :  { %v3712_v4 = vpop.f32.mrb[10].mxu1 }
 0xac7   :  { %v1568_v5 = vadd.f32 %v3712_v4, %v3425_v3  ;;  %v1562_v41 = vpop.f32.mrb[11].mxu1 }
 0xac8   :  { %v1563_v6 = vadd.f32 %v3425_v3, %v1562_v41  ;;  %v3433_v41 = vld [vmem:[%s4808_s19] ss:$0 sm:$0xff] }
 0xac9   :  { %v1572_v7 = vmul.f32 %v1568_v5, %v1568_v5 }
 0xaca   :  { %v1571_v8 = vmul.f32 %v1563_v6, %v1563_v6 }
 0xacb   :  { %v1574_v9 = vmul.f32 %v1572_v7, %v1568_v5 }
 0xacc   :  { %v1573_v10 = vmul.f32 %v1571_v8, %v1563_v6 }
 0xacd   :  { %v1576_v11 = vmul.f32 0.044715, %v1574_v9 }
 0xace   :  { %v1575_v12 = vmul.f32 0.044715, %v1573_v10 }
 0xacf   :  { %v1578_v13 = vadd.f32 %v1576_v11, %v1568_v5 }
 0xad0   :  { %v1577_v14 = vadd.f32 %v1575_v12, %v1563_v6 }
 0xad1   :  { %v1580_v15 = vmul.f32 0.7978846, %v1578_v13 }
 0xad2   :  { %v1579_v16 = vmul.f32 0.7978846, %v1577_v14 }
 0xad3   :  { %4179 = vtanh.f32 %v1580_v15 }
 0xad4   :  { %4181 = vtanh.f32 %v1579_v16 }
 0xadd   :  { %v4180_v17 = vpop.eup %4179 }
 0xade   :  { %v4182_v18 = vpop.eup %4181  ;;  %v1584_v19 = vadd.f32 1.0, %v4180_v17 }
 0xadf   :  { %v1583_v20 = vadd.f32 1.0, %v4182_v18 }
 0xae0   :  { %v1586_v21 = vmul.f32 0.5, %v1584_v19 }
 0xae1   :  { %v1585_v22 = vmul.f32 0.5, %v1583_v20 }
 0xae2   :  { %v1588_v24 = vmul.f32 %v1586_v21, %v1568_v5 }
 0xae3   :  { %v1587_v23 = vmul.f32 %v1585_v22, %v1563_v6 }
 0xae5   :  { %3729 = vmatprep.mubr.msk.f32.mxu0 %vm1595_vm4, %v1587_v23 }
 0xae6   :  { %3730 = vmatmul.mubr.msk.f32.vlgmr.msra.gmra.mrb[10].mxu0 %vm1595_vm4, %v1588_v24 }
 0xbb9   :  { %v3731_v35 = vpop.f32.mrb[10].mxu0 }
 0xbba   :  { %v1668_v33 = vpop.f32.mrb[11].mxu0  ;;  %v1674_v26 = vadd.f32 %v3731_v35, %v3428_v25 }
 0xbbb   :  { %v1669_v27 = vadd.f32 %v3428_v25, %v1668_v33 }
 0xbbc   :  { %v1678_v30 = vadd.f32 %v1674_v26, %v1483_v52 }
 0xbbd   :  { %v1677_v28 = vadd.f32 %v1669_v27, %v1482_v50  ;;  %v1724_v50 = vld [vmem:[%s4805_s3 + $0x18] sm:$0xff] }
 0xbbe   :  { %v1682_v31 = vsel %vm127_vm0, %v1678_v30, 0.0  ;;  %v3932_v51 = vpack.c.bf16 %v1724_v50, %v1723_v38 }
 0xbbf   :  { %v1679_v29 = vsel %vm127_vm0, %v1677_v28, 0.0 }
 0xbc0   :  { %1680 = vadd.xlane.f32.xlu0 %v1679_v29  ;;  %3933 = vmatprep.subr.bf16.mxu1 %v3932_v51 }
 0xbc1   :  { %3935 = vmatpush3.bf16.msra.mxu1 %v3932_v51 }
 0xbc4   :  { %1683 = vadd.xlane.f32.xlu0 %v1682_v31 }
 0xc4d   :  { %v1681_v32 = vpop.xlane.xlu0 %1680 }
 0xc4e   :  { %v1685_v34 = vmul.f32 0.03125, %v1681_v32 }
 0xc50   :  { %v1687_v36 = vsub.f32 %v1677_v28, %v1685_v34 }
 0xc51   :  { %v1684_v37 = vpop.xlane.xlu0 %1683 }
 0xc52   :  { %v1686_v39 = vmul.f32 0.03125, %v1684_v37  ;;  %v1689_v42 = vmul.f32 %v1687_v36, %v1687_v36 }
 0xc54   :  { %v1688_v43 = vsub.f32 %v1678_v30, %v1686_v39  ;;  %v1691_v44 = vsel %vm127_vm0, %v1689_v42, 0.0 }
 0xc55   :  { %1692 = vadd.xlane.f32.xlu0 %v1691_v44 }
 0xc56   :  { %v1690_v45 = vmul.f32 %v1688_v43, %v1688_v43 }
 0xc58   :  { %v1694_v40 = vsel %vm127_vm0, %v1690_v45, 0.0 }
 0xc59   :  { %1695 = vadd.xlane.f32.xlu1 %v1694_v40 }
 0xce2   :  { %v1693_v52 = vpop.xlane.xlu0 %1692 }
 0xce3   :  { %v1697_v53 = vmul.f32 0.03125, %v1693_v52 }
 0xce5   :  { %v1699_v54 = vadd.f32 1e-12, %v1697_v53 }
 0xce6   :  { %v1696_v55 = vpop.xlane.xlu1 %1695 }
 0xce7   :  { %4183 = vrsqrt.f32 %v1699_v54  ;;  %v1698_v56 = vmul.f32 0.03125, %v1696_v55 }
 0xce9   :  { %v1700_v57 = vadd.f32 1e-12, %v1698_v56 }
 0xceb   :  { %4185 = vrsqrt.f32 %v1700_v57 }
 0xcf1   :  { %v4184_v58 = vpop.eup %4183 }
 0xcf2   :  { %v1703_v61 = vmul.f32 %v4184_v58, %v1687_v36 }
 0xcf4   :  { %v1711_v0 = vmul.f32 %v3431_v59, %v1703_v61 }
 0xcf5   :  { %v4186_v1 = vpop.eup %4185 }
 0xcf6   :  { %v1704_v2 = vmul.f32 %v4186_v1, %v1688_v43  ;;  %v4632_v3 = vadd.f32 %v3432_v62, %v1711_v0 }
 0xcf8   :  { %v1712_v4 = vmul.f32 %v3431_v59, %v1704_v2  ;;  %3740 = vmatprep.mubr.msk.f32.mxu1 %vm127_vm0, %v4632_v3 }
 0xcfa   :  { %v4636_v5 = vadd.f32 %v3432_v62, %v1712_v4 }
 0xcfc   :  { %3741 = vmatmul.mubr.msk.f32.vlgmr.msra.gmra.mrb[12].mxu1 %vm127_vm0, %v4636_v5 }
 0xdcf   :  { %v3742_v6 = vpop.f32.mrb[12].mxu1 }
 0xdd0   :  { %v4641_v7 = vadd.f32 %v3742_v6, %v3433_v41  ;;  %v1827_v8 = vpop.f32.mrb[13].mxu1 }
 0xdd1   :  { %v4643_v9 = vadd.f32 %v3433_v41, %v1827_v8 }
 0xdd3   :  { %3747 = vmatprep.mubr.msk.f32.mxu1 %vm294_vm1, %v4643_v9  ;;  %v4649_v10 = vpack.i.bf16 %v4641_v7, %v4643_v9 }
 0xdd5   :  { %4105 = vrot.lane.b32.xlu1 %v4649_v10, %s4286_s0  ;;  %4100 = vrot.lane.b32.xlu0 %v4649_v10, %s4287_s5 }
 0xdd9   :  { %2038 = vrot.lane.b32.xlu1 %v4643_v9, %s4288_s9  ;;  %4110 = vrot.lane.b32.xlu0 %v4649_v10, %s4289_s13 }
 0xddd   :  { %2040 = vrot.lane.b32.xlu1 %v4641_v7, %s4288_s9  ;;  %2406 = vrot.lane.b32.xlu0 %v4641_v7, %s4290_s25 }
 0xde1   :  { %2404 = vrot.lane.b32.xlu1 %v4643_v9, %s4290_s25 }
 0xe47   :  { %v4106_v11 = vpop.permute.xlu1 %4105  ;;  %v4101_v12 = vpop.permute.xlu0 %4100 }
 0xe48   :  { %v4108_v13 = vunpack.i.h.bf16 %v4106_v11  ;;  %v4107_v14 = vunpack.i.l.bf16 %v4106_v11  ;;  %v4103_v15 = vunpack.i.h.bf16 %v4101_v12  ;;  %v4102_v16 = vunpack.i.l.bf16 %v4101_v12 }
 0xe4a   :  { %v3936_v17 = vpack.c.bf16 %v4103_v15, %v4102_v16  ;;  %v3946_v18 = vpack.c.bf16 %v4108_v13, %v4107_v14 }
 0xe4b   :  { %v4111_v19 = vpop.permute.xlu0 %4110  ;;  %v2039_v20 = vpop.permute.xlu1 %2038 }
 0xe4c   :  { %3938 = vmatprep.subr.msk.bf16.mxu1 %vm4503_vm2, %v3936_v17  ;;  %v4113_v21 = vunpack.i.h.bf16 %v4111_v19  ;;  %v4112_v22 = vunpack.i.l.bf16 %v4111_v19 }
 0xe4d   :  { %3941 = vmatpush3.bf16.xpose.msk.msra.mxu1 %vm4503_vm2, %v3936_v17 }
 0xe4e   :  { %3948 = vmatprep.subr.msk.bf16.mxu1 %vm4503_vm2, %v3946_v18  ;;  %v3956_v23 = vpack.c.bf16 %v4113_v21, %v4112_v22 }
 0xe4f   :  { %v2041_v24 = vpop.permute.xlu1 %2040  ;;  %v2407_v35 = vpop.permute.xlu0 %2406 }
 0xe53   :  { %v2405_v25 = vpop.permute.xlu1 %2404 }
 0xe54   :  { %3748 = vmatmul.mubr.msk.f32.vlgmr.msra.gmra.mrb[14].mxu1 %vm294_vm1, %v4641_v7 }
 0xe55   :  { %3951 = vmatpush3.bf16.xpose.msk.msra.mxu1 %vm4503_vm2, %v3946_v18  ;;  %3761 = vmatprep.mubr.msk.f32.mxu1 %vm294_vm1, %v2039_v20 }
 0xe56   :  { %3958 = vmatprep.subr.msk.bf16.mxu1 %vm4503_vm2, %v3956_v23 }
 0xe5c   :  { %3762 = vmatmul.mubr.msk.f32.vlgmr.msra.gmra.mrb[16].mxu1 %vm294_vm1, %v2041_v24 }
 0xe5d   :  { %3961 = vmatpush3.bf16.xpose.msk.msra.mxu1 %vm4503_vm2, %v3956_v23  ;;  %3785 = vmatprep.mubr.msk.f32.mxu1 %vm294_vm1, %v2405_v25 }
 0xe64   :  { %3786 = vmatmul.mubr.msk.f32.vlgmr.msra.gmra.mrb[18].mxu1 %vm294_vm1, %v2407_v35 }
 0xf27   :  { %v3749_v33 = vpop.f32.mrb[14].mxu1 }
 0xf28   :  { %v1926_v26 = vmul.f32 0.35355338, %v3749_v33  ;;  %v1916_v27 = vpop.f32.mrb[15].mxu1 }
 0xf29   :  { %v1925_v28 = vmul.f32 0.35355338, %v1916_v27 }
 0xf2a   :  { %v1928_v29 = vadd.f32 %v1926_v26, %v4526_v60 }
 0xf2b   :  { %v1927_v30 = vadd.f32 %v1925_v28, %v4529_v63 }
 0xf2c   :  { %v1932_v31 = vsel %vm382_vm3, %v1928_v29, -inf }
 0xf2d   :  { %1933 = vmax.xlane.f32.xlu0 %v1932_v31  ;;  %v1929_v32 = vsel %vm382_vm3, %v1927_v30, -inf }
 0xf2e   :  { %1930 = vmax.xlane.f32.xlu1 %v1929_v32 }
 0xf2f   :  { %v3763_v34 = vpop.f32.mrb[16].mxu1 }
 0xf30   :  { %v2120_v36 = vpop.f32.mrb[17].mxu1  ;;  %v2130_v37 = vmul.f32 0.35355338, %v3763_v34 }
 0xf31   :  { %v2129_v39 = vmul.f32 0.35355338, %v2120_v36 }
 0xf32   :  { %v2132_v44 = vadd.f32 %v2130_v37, %v4526_v60 }
 0xf33   :  { %v2131_v42 = vadd.f32 %v2129_v39, %v4529_v63 }
 0xf34   :  { %v2136_v46 = vsel %vm382_vm3, %v2132_v44, -inf }
 0xf35   :  { %v2133_v43 = vsel %vm382_vm3, %v2131_v42, -inf }
 0xf36   :  { %2134 = vmax.xlane.f32.xlu0 %v2133_v43 }
 0xf37   :  { %v3787_v45 = vpop.f32.mrb[18].mxu1 }
 0xf38   :  { %v2486_v40 = vpop.f32.mrb[19].mxu1  ;;  %v2496_v11 = vmul.f32 0.35355338, %v3787_v45 }
 0xf39   :  { %v2495_v6 = vmul.f32 0.35355338, %v2486_v40 }
 0xf3a   :  { %2137 = vmax.xlane.f32.xlu0 %v2136_v46  ;;  %v2498_v13 = vadd.f32 %v2496_v11, %v4526_v60 }
 0xf3b   :  { %v2497_v8 = vadd.f32 %v2495_v6, %v4529_v63 }
 0xf3c   :  { %v2502_v14 = vsel %vm382_vm3, %v2498_v13, -inf }
 0xf3d   :  { %v2499_v12 = vsel %vm382_vm3, %v2497_v8, -inf }
 0xfba   :  { %v1934_v47 = vpop.xlane.xlu0 %1933 }
 0xfbb   :  { %v1936_v49 = vsub.f32 %v1928_v29, %v1934_v47  ;;  %v1931_v38 = vpop.xlane.xlu1 %1930 }
 0xfbc   :  { %v1935_v50 = vsub.f32 %v1927_v30, %v1931_v38  ;;  %v1726_v38 = vld [vmem:[%s4809_s24] sm:$0xff] }
 0xfbd   :  { %v1939_v51 = vmul.f32 1.442695, %v1936_v49  ;;  %v1727_v49 = vld [vmem:[%s4809_s24 + $0x8] sm:$0xff] }
 0xfbe   :  { %v1937_v52 = vmul.f32 1.442695, %v1935_v50 }
 0xfbf   :  { %4187 = vpow2.f32 %v1939_v51 }
 0xfc0   :  { %4189 = vpow2.f32 %v1937_v52 }
 0xfc3   :  { %v2135_v53 = vpop.xlane.xlu0 %2134 }
 0xfc4   :  { %v2139_v54 = vsub.f32 %v2131_v42, %v2135_v53 }
 0xfc6   :  { %v2141_v55 = vmul.f32 1.442695, %v2139_v54 }
 0xfc7   :  { %v2138_v56 = vpop.xlane.xlu0 %2137 }
 0xfc8   :  { %4191 = vpow2.f32 %v2141_v55  ;;  %v2140_v57 = vsub.f32 %v2132_v44, %v2138_v56 }
 0xfc9   :  { %v4188_v58 = vpop.eup %4187 }
 0xfca   :  { %v4190_v59 = vpop.eup %4189  ;;  %v2143_v61 = vmul.f32 1.442695, %v2140_v57  ;;  %v1944_v62 = vsel %vm382_vm3, %v4188_v58, 0.0 }
 0xfcb   :  { %1945 = vadd.xlane.f32.xlu0 %v1944_v62  ;;  %v1941_v0 = vsel %vm382_vm3, %v4190_v59, 0.0 }
 0xfcc   :  { %4193 = vpow2.f32 %v2143_v61  ;;  %1942 = vadd.xlane.f32.xlu1 %v1941_v0 }
 0xfd2   :  { %v4192_v1 = vpop.eup %4191 }
 0xfd3   :  { %v2145_v2 = vsel %vm382_vm3, %v4192_v1, 0.0 }
 0xfd4   :  { %2146 = vadd.xlane.f32.xlu1 %v2145_v2 }
 0xfd6   :  { %v4194_v4 = vpop.eup %4193 }
 0xfd7   :  { %v2148_v41 = vsel %vm382_vm3, %v4194_v4, 0.0 }
 0xfd8   :  { %2149 = vadd.xlane.f32.xlu0 %v2148_v41 }
 0xfe5   :  { %4115 = vrot.lane.b32.xlu1 %v4649_v10, %s4291_s29 }
 0xfe9   :  { %4125 = vrot.lane.b32.xlu1 %v4649_v10, %s4292_s7 }
 0xfed   :  { %2691 = vrot.lane.b32.xlu1 %v4643_v9, %s4293_s10 }
 0xfee   :  { %4120 = vrot.lane.b32.xlu0 %v4649_v10, %s4294_s11 }
 0xff1   :  { %2693 = vrot.lane.b32.xlu1 %v4641_v7, %s4293_s10 }
0x100d   :  { %2500 = vmax.xlane.f32.xlu0 %v2499_v12  ;;  %v4232_v12 = vld [vmem:[%s4324_s17 + $0x8] sm:$0xff] }
0x1015   :  { %2503 = vmax.xlane.f32.xlu1 %v2502_v14 }
0x1058   :  { %v1946_v9 = vpop.xlane.xlu0 %1945 }
0x1059   :  { %v1943_v15 = vpop.xlane.xlu1 %1942 }
0x105a   :  { %4195 = vrcp.f32 %v1943_v15 }
0x105b   :  { %4197 = vrcp.f32 %v1946_v9  ;;  %v1728_v9 = vld [vmem:[%s4809_s24 + $0x10] sm:$0xff] }
0x1061   :  { %v2147_v16 = vpop.xlane.xlu1 %2146 }
0x1062   :  { %4199 = vrcp.f32 %v2147_v16 }
0x1064   :  { %v4196_v17 = vpop.eup %4195 }
0x1065   :  { %v2150_v7 = vpop.xlane.xlu0 %2149  ;;  %v4116_v18 = vpop.permute.xlu1 %4115  ;;  %v1949_v19 = vmul.f32 %v4196_v17, %v4190_v59 }
0x1066   :  { %4201 = vrcp.f32 %v2150_v7  ;;  %v4118_v63 = vunpack.i.h.bf16 %v4116_v18  ;;  %v4117_v20 = vunpack.i.l.bf16 %v4116_v18  ;;  %v4198_v60 = vpop.eup %4197 }
0x1067   :  { %3754 = vmatprep.mubr.msk.f32.mxu0 %vm382_vm3, %v1949_v19  ;;  %v1950_v27 = vmul.f32 %v4198_v60, %v4188_v58 }
0x1068   :  { %v3942_v21 = vpack.c.bf16 %v4118_v63, %v4117_v20 }
0x1069   :  { %v4121_v22 = vpop.permute.xlu0 %4120  ;;  %v4126_v23 = vpop.permute.xlu1 %4125 }
0x106a   :  { %v4123_v24 = vunpack.i.h.bf16 %v4121_v22  ;;  %v4122_v25 = vunpack.i.l.bf16 %v4121_v22  ;;  %v4128_v35 = vunpack.i.h.bf16 %v4126_v23  ;;  %v4127_v33 = vunpack.i.l.bf16 %v4126_v23  ;;  %3943 = vmatprep.subr.bf16.mxu0 %v3942_v21 }
0x106b   :  { %3945 = vmatpush3.bf16.msra.mxu0 %v3942_v21 }
0x106c   :  { %v4200_v26 = vpop.eup %4199  ;;  %v3952_v28 = vpack.c.bf16 %v4123_v24, %v4122_v25  ;;  %v3966_v29 = vpack.c.bf16 %v4128_v35, %v4127_v33 }
0x106d   :  { %v2692_v30 = vpop.permute.xlu1 %2691  ;;  %v2153_v31 = vmul.f32 %v4200_v26, %v4192_v1 }
0x106e   :  { %3755 = vmatmul.mubr.msk.f32.vlgmr.msra.gmra.mrb[12].mxu0 %vm382_vm3, %v1950_v27  ;;  %3953 = vmatprep.subr.bf16.mxu0 %v3952_v28 }
0x106f   :  { %3968 = vmatprep.subr.msk.bf16.mxu1 %vm4503_vm2, %v3966_v29  ;;  %3804 = vmatprep.mubr.msk.f32.mxu1 %vm294_vm1, %v2692_v30 }
0x1070   :  { %v4202_v32 = vpop.eup %4201  ;;  %3955 = vmatpush3.bf16.msra.mxu0 %v3952_v28  ;;  %3768 = vmatprep.mubr.msk.f32.mxu0 %vm382_vm3, %v2153_v31 }
0x1071   :  { %v2154_v34 = vmul.f32 %v4202_v32, %v4194_v4  ;;  %3971 = vmatpush3.bf16.xpose.msk.msra.mxu1 %vm4503_vm2, %v3966_v29  ;;  %v2694_v36 = vpop.permute.xlu1 %2693  ;;  %3771 = vmatprep.subr.mxu0 %v1727_v49  ;;  %v4231_v4 = vld [vmem:[%s4324_s17] sm:$0xff]  ;;  %s4810_s17 = sld [smem:[#allocation11_spill]]  ;;  %v1729_v29 = vld [vmem:[%s4809_s24 + $0x18] sm:$0xff] }
0x1073   :  { %3769 = vmatmul.mubr.msk.f32.vlgmr.msra.gmra.mrb[14].mxu0 %vm382_vm3, %v2154_v34 }
0x1074   :  { %3772 = vmatpush3.msra.mxu0 %v1727_v49 }
0x1075   :  { %3776 = vmatprep.subr.mxu0 %v1726_v38 }
0x1078   :  { %3805 = vmatmul.mubr.msk.f32.vlgmr.msra.gmra.mrb[20].mxu1 %vm294_vm1, %v2694_v36 }
0x109a   :  { %v2501_v37 = vpop.xlane.xlu0 %2500 }
0x109b   :  { %v2505_v39 = vsub.f32 %v2497_v8, %v2501_v37  ;;  %v3468_v37 = vld [vmem:[%s4810_s17] ss:$0 sm:$0xff] }
0x109d   :  { %v2507_v44 = vmul.f32 1.442695, %v2505_v39 }
0x10a2   :  { %v2504_v42 = vpop.xlane.xlu1 %2503 }
0x10a3   :  { %v2506_v43 = vsub.f32 %v2498_v13, %v2504_v42 }
0x10a5   :  { %v2509_v45 = vmul.f32 1.442695, %v2506_v43 }
0x10a7   :  { %4203 = vpow2.f32 %v2509_v45 }
0x10a8   :  { %4205 = vpow2.f32 %v2507_v44 }
0x10b1   :  { %v4204_v40 = vpop.eup %4203 }
0x10b2   :  { %v2514_v46 = vsel %vm382_vm3, %v4204_v40, 0.0  ;;  %v4206_v48 = vpop.eup %4205 }
0x10b3   :  { %2515 = vadd.xlane.f32.xlu0 %v2514_v46  ;;  %v2511_v47 = vsel %vm382_vm3, %v4206_v48, 0.0 }
0x10b7   :  { %2512 = vadd.xlane.f32.xlu0 %v2511_v47 }
0x10cd   :  { %4130 = vrot.lane.b32.xlu0 %v4649_v10, %s4295_s15 }
0x1140   :  { %v2516_v50 = vpop.xlane.xlu0 %2515 }
0x1141   :  { %v3756_v51 = vpop.f32.mrb[12].mxu0 }
0x1142   :  { %v2029_v52 = vpop.f32.mrb[13].mxu0 }
0x1144   :  { %v2513_v53 = vpop.xlane.xlu0 %2512 }
0x1145   :  { %4207 = vrcp.f32 %v2513_v53 }
0x1146   :  { %4209 = vrcp.f32 %v2516_v50  ;;  %v3770_v54 = vpop.f32.mrb[14].mxu0 }
0x1147   :  { %v2233_v55 = vpop.f32.mrb[15].mxu0 }
0x1148   :  { %v4131_v56 = vpop.permute.xlu0 %4130  ;;  %3773 = vmatprep.mubr.msk.f32.mxu0 %vm294_vm1, %v2233_v55  ;;  %v1733_v55 = vld [vmem:[%s4811_s30] sm:$0xff] }
0x1149   :  { %v4133_v57 = vunpack.i.h.bf16 %v4131_v56  ;;  %v4132_v58 = vunpack.i.l.bf16 %v4131_v56  ;;  %3774 = vmatmul.mubr.msk.f32.vlgmr.msra.gmra.mrb[16].mxu0 %vm294_vm1, %v3770_v54  ;;  %v1734_v56 = vld [vmem:[%s4811_s30 + $0x8] sm:$0xff] }
0x114a   :  { %3778 = vmatprep.mubr.msk.f32.mxu0 %vm294_vm1, %v2029_v52  ;;  %3777 = vmatpush3.msra.mxu0 %v1726_v38 }
0x114b   :  { %v3962_v59 = vpack.c.bf16 %v4133_v57, %v4132_v58  ;;  %v3806_v61 = vpop.f32.mrb[20].mxu1  ;;  %v3976_v57 = vpack.c.bf16 %v1734_v56, %v1733_v55  ;;  %v1735_v58 = vld [vmem:[%s4811_s30 + $0x10] sm:$0xff] }
0x114c   :  { %v2773_v62 = vpop.f32.mrb[21].mxu1  ;;  %v2783_v0 = vmul.f32 0.35355338, %v3806_v61 }
0x114d   :  { %v2782_v1 = vmul.f32 0.35355338, %v2773_v62  ;;  %3963 = vmatprep.subr.bf16.mxu0 %v3962_v59  ;;  %3977 = vmatprep.subr.bf16.mxu1 %v3976_v57 }
0x114e   :  { %v2785_v13 = vadd.f32 %v4232_v12, %v2783_v0  ;;  %3979 = vmatpush3.bf16.msra.mxu1 %v3976_v57  ;;  %v3470_v12 = vld [vmem:[%s4813_s12] ss:$0 sm:$0xff] }
0x114f   :  { %v4208_v2 = vpop.eup %4207  ;;  %v2784_v41 = vadd.f32 %v4231_v4, %v2782_v1 }
0x1150   :  { %v4210_v6 = vpop.eup %4209  ;;  %v2519_v8 = vmul.f32 %v4208_v2, %v4206_v48  ;;  %v2789_v15 = vsel %vm382_vm3, %v2785_v13, -inf }
0x1151   :  { %v2786_v11 = vsel %vm382_vm3, %v2784_v41, -inf  ;;  %3779 = vmatmul.mubr.msk.f32.vlgmr.msra.gmra.mrb[16].mxu0 %vm294_vm1, %v3756_v51  ;;  %v2520_v14 = vmul.f32 %v4210_v6, %v4204_v40 }
0x1152   :  { %2787 = vmax.xlane.f32.xlu1 %v2786_v11  ;;  %3965 = vmatpush3.bf16.msra.mxu0 %v3962_v59  ;;  %v1736_v59 = vld [vmem:[%s4811_s30 + $0x18] sm:$0xff] }
0x1153   :  { %3792 = vmatprep.mubr.msk.f32.mxu0 %vm382_vm3, %v2519_v8  ;;  %3795 = vmatprep.subr.mxu0 %v1728_v9  ;;  %v3980_v61 = vpack.c.bf16 %v1736_v59, %v1735_v58  ;;  %v3469_v8 = vld [vmem:[%s4812_s6] ss:$0 sm:$0xff] }
0x1155   :  { %3793 = vmatmul.mubr.msk.f32.vlgmr.msra.gmra.mrb[18].mxu0 %vm382_vm3, %v2520_v14  ;;  %3981 = vmatprep.subr.bf16.mxu1 %v3980_v61 }
0x1156   :  { %2790 = vmax.xlane.f32.xlu1 %v2789_v15  ;;  %3796 = vmatpush3.msra.mxu0 %v1728_v9 }
0x1157   :  { %3983 = vmatpush3.bf16.msra.mxu1 %v3980_v61 }
0x11df   :  { %v2788_v16 = vpop.xlane.xlu1 %2787 }
0x11e0   :  { %v2792_v17 = vsub.f32 %v2784_v41, %v2788_v16 }
0x11e2   :  { %v2794_v19 = vmul.f32 1.442695, %v2792_v17 }
0x11e3   :  { %v2791_v7 = vpop.xlane.xlu1 %2790 }
0x11e4   :  { %v2793_v18 = vsub.f32 %v2785_v13, %v2791_v7  ;;  %v1738_v7 = vld [vmem:[%s4814_s18] sm:$0xff] }
0x11e6   :  { %v2796_v63 = vmul.f32 1.442695, %v2793_v18  ;;  %v1739_v18 = vld [vmem:[%s4814_s18 + $0x8] sm:$0xff] }
0x11e8   :  { %4211 = vpow2.f32 %v2796_v63  ;;  %v1740_v63 = vld [vmem:[%s4814_s18 + $0x10] sm:$0xff] }
0x11e9   :  { %4213 = vpow2.f32 %v2794_v19  ;;  %v3984_v19 = vpack.c.bf16 %v1739_v18, %v1738_v7  ;;  %v3477_v7 = vld [vmem:[%s4444_s20] ss:$0 sm:$0xff]  ;;  %s4233_s20 = scalar_lea.vmem %s3349_s26, 32 }
0x11ea   :  { %p4234_p0 = scmp.ne.s32.totalorder %s3349_s26, %s4233_s20  ;;  %p4239_p2 = scmp.lt.s32.totalorder %s4233_s20, %s4233_s20 }
0x11ec   :  { %p4240_p3 = por %p4239_p2, %p4238_p1 }
0x11ee   :  { %p4241_p4 = pnand %p4240_p3, %p4234_p0 }
0x11f2   :  { %v4212_v20 = vpop.eup %4211 }
0x11f3   :  { %v2801_v21 = vsel %vm382_vm3, %v4212_v20, 0.0  ;;  %v4214_v60 = vpop.eup %4213 }
0x11f4   :  { %2802 = vadd.xlane.f32.xlu1 %v2801_v21  ;;  %v2798_v22 = vsel %vm382_vm3, %v4214_v60, 0.0 }
0x11f8   :  { %2799 = vadd.xlane.f32.xlu1 %v2798_v22  ;;  %v1743_v22 = vld [vmem:[%s4814_s18 + $0x28] sm:$0xff] }
0x1209   :  { %4135 = vrot.lane.b32.xlu1 %v4649_v10, %s4296_s16 }
0x1228   :  { %v3794_v23 = vpop.f32.mrb[18].mxu0 }
0x1229   :  { %v2599_v24 = vpop.f32.mrb[19].mxu0 }
0x122a   :  { %3797 = vmatprep.mubr.msk.f32.mxu0 %vm294_vm1, %v2599_v24  ;;  %v1744_v24 = vld [vmem:[%s4814_s18 + $0x30] sm:$0xff] }
0x122b   :  { %3798 = vmatmul.mubr.msk.f32.vlgmr.msra.gmra.mrb[16].mxu0 %vm294_vm1, %v3794_v23 }
0x1281   :  { %v2803_v25 = vpop.xlane.xlu1 %2802 }
0x1282   :  { %4215 = vrcp.f32 %v2803_v25  ;;  %v1745_v25 = vld [vmem:[%s4814_s18 + $0x38] sm:$0xff] }
0x1285   :  { %v2800_v35 = vpop.xlane.xlu1 %2799 }
0x1286   :  { %4217 = vrcp.f32 %v2800_v35  ;;  %v3996_v35 = vpack.c.bf16 %v1745_v25, %v1744_v24 }
0x1289   :  { %v4136_v33 = vpop.permute.xlu1 %4135 }
0x128a   :  { %v4138_v26 = vunpack.i.h.bf16 %v4136_v33  ;;  %v4137_v27 = vunpack.i.l.bf16 %v4136_v33  ;;  %v3471_v33 = vld [vmem:[%s4815_s22] ss:$0 sm:$0xff] }
0x128c   :  { %v3972_v28 = vpack.c.bf16 %v4138_v26, %v4137_v27  ;;  %v4216_v30 = vpop.eup %4215 }
0x128d   :  { %v2807_v32 = vmul.f32 %v4216_v30, %v4212_v20  ;;  %v1741_v20 = vld [vmem:[%s4814_s18 + $0x18] sm:$0xff] }
0x128e   :  { %3973 = vmatprep.subr.bf16.mxu0 %v3972_v28  ;;  %v3988_v21 = vpack.c.bf16 %v1741_v20, %v1740_v63  ;;  %v3478_v20 = vld [vmem:[%s4449_s27] ss:$0 sm:$0xff] }
0x128f   :  { %3975 = vmatpush3.bf16.msra.mxu0 %v3972_v28 }
0x1290   :  { %v4218_v10 = vpop.eup %4217  ;;  %3814 = vmatprep.subr.mxu0 %v1729_v29 }
0x1291   :  { %v2806_v31 = vmul.f32 %v4218_v10, %v4214_v60  ;;  %v1742_v60 = vld [vmem:[%s4814_s18 + $0x20] sm:$0xff] }
0x1292   :  { %v3992_v23 = vpack.c.bf16 %v1743_v22, %v1742_v60 }
0x1293   :  { %3811 = vmatprep.mubr.msk.f32.mxu0 %vm382_vm3, %v2806_v31 }
0x1294   :  { %3812 = vmatmul.mubr.msk.f32.vlgmr.msra.gmra.mrb[20].mxu0 %vm382_vm3, %v2807_v32 }
0x1295   :  { %3815 = vmatpush3.msra.mxu0 %v1729_v29 }
0x1296   :  { %3985 = vmatprep.subr.bf16.mxu0 %v3984_v19 }
0x1367   :  { %v3813_v34 = vpop.f32.mrb[20].mxu0 }
0x1368   :  { %v2886_v36 = vpop.f32.mrb[21].mxu0 }
0x1369   :  { %3816 = vmatprep.mubr.msk.f32.mxu0 %vm294_vm1, %v2886_v36 }
0x136a   :  { %3817 = vmatmul.mubr.msk.f32.vlgmr.msra.gmra.mrb[16].mxu0 %vm294_vm1, %v3813_v34 }
0x136b   :  { %3987 = vmatpush3.bf16.msra.mxu0 %v3984_v19 }
0x136c   :  { %3989 = vmatprep.subr.bf16.mxu0 %v3988_v21 }
0x136f   :  { %3991 = vmatpush3.bf16.msra.mxu0 %v3988_v21 }
0x1370   :  { %3993 = vmatprep.subr.bf16.mxu0 %v3992_v23 }
0x1373   :  { %3995 = vmatpush3.bf16.msra.mxu0 %v3992_v23 }
0x1374   :  { %3997 = vmatprep.subr.bf16.mxu0 %v3996_v35 }
0x1377   :  { %3999 = vmatpush3.bf16.msra.mxu0 %v3996_v35 }
0x143d   :  { %v3818_v39 = vpop.f32.mrb[16].mxu0 }
0x143e   :  { %v2985_v42 = vadd.f32 %v3818_v39, %v3468_v37  ;;  %v2967_v43 = vpop.f32.mrb[17].mxu0 }
0x143f   :  { %v2984_v44 = vadd.f32 %v3468_v37, %v2967_v43 }
0x1440   :  { %v2987_v45 = vadd.f32 %v2985_v42, %v4636_v5 }
0x1441   :  { %v2986_v40 = vadd.f32 %v2984_v44, %v4632_v3 }
0x1442   :  { %v2991_v46 = vsel %vm127_vm0, %v2987_v45, 0.0 }
0x1443   :  { %2992 = vadd.xlane.f32.xlu1 %v2991_v46  ;;  %v2988_v48 = vsel %vm127_vm0, %v2986_v40, 0.0 }
0x1444   :  { %2989 = vadd.xlane.f32.xlu0 %v2988_v48 }
0x14d0   :  { %v2993_v47 = vpop.xlane.xlu1 %2992 }
0x14d1   :  { %v2995_v49 = vmul.f32 0.03125, %v2993_v47  ;;  %v2990_v38 = vpop.xlane.xlu0 %2989 }
0x14d2   :  { %v2994_v50 = vmul.f32 0.03125, %v2990_v38 }
0x14d3   :  { %v2997_v51 = vsub.f32 %v2987_v45, %v2995_v49 }
0x14d4   :  { %v2996_v52 = vsub.f32 %v2986_v40, %v2994_v50  ;;  %v3474_v50 = vld [vmem:[%s4439_s21] ss:$0 sm:$0xff]  ;;  %s4816_s21 = sld [smem:[#allocation5_spill]] }
0x14d5   :  { %v2999_v3 = vmul.f32 %v2997_v51, %v2997_v51 }
0x14d6   :  { %v2998_v53 = vmul.f32 %v2996_v52, %v2996_v52 }
0x14d7   :  { %v3003_v54 = vsel %vm127_vm0, %v2999_v3, 0.0 }
0x14d8   :  { %v3000_v5 = vsel %vm127_vm0, %v2998_v53, 0.0 }
0x14d9   :  { %3001 = vadd.xlane.f32.xlu0 %v3000_v5 }
0x14da   :  { %v3266_v24 = vld [vmem:[%s4816_s21] sm:$0x3] }
0x14dd   :  { %3004 = vadd.xlane.f32.xlu0 %v3003_v54 }
0x1566   :  { %v3002_v62 = vpop.xlane.xlu0 %3001 }
0x1567   :  { %v3006_v0 = vmul.f32 0.03125, %v3002_v62 }
0x1569   :  { %v3008_v1 = vadd.f32 1e-12, %v3006_v0 }
0x156a   :  { %v3005_v2 = vpop.xlane.xlu0 %3004 }
0x156b   :  { %4219 = vrsqrt.f32 %v3008_v1  ;;  %v3007_v4 = vmul.f32 0.03125, %v3005_v2 }
0x156d   :  { %v3009_v41 = vadd.f32 1e-12, %v3007_v4 }
0x156f   :  { %4221 = vrsqrt.f32 %v3009_v41 }
0x1575   :  { %v4220_v6 = vpop.eup %4219 }
0x1576   :  { %v3012_v11 = vmul.f32 %v4220_v6, %v2996_v52  ;;  %v4297_v6 = vmov 0.0|0.0  }
0x1577   :  { %4000 = vmatprep.subr.bf16.mxu1 %v4297_v6 }
0x1578   :  { %v3020_v13 = vmul.f32 %v3469_v8, %v3012_v11 }
0x1579   :  { %v4222_v14 = vpop.eup %4221 }
0x157a   :  { %v3013_v15 = vmul.f32 %v4222_v14, %v2997_v51  ;;  %v3028_v9 = vadd.f32 %v3470_v12, %v3020_v13 }
0x157c   :  { %v3021_v16 = vmul.f32 %v3469_v8, %v3013_v15  ;;  %3827 = vmatprep.mubr.msk.f32.mxu1 %vm127_vm0, %v3028_v9  ;;  %v4299_v8 = vmov 0.0  }
0x157e   :  { %v3029_v17 = vadd.f32 %v3470_v12, %v3021_v16 }
0x1580   :  { %3828 = vmatmul.mubr.msk.f32.vlgmr.msra.gmra.mrb[22].mxu1 %vm127_vm0, %v3029_v17 }
0x1581   :  { %3853 = vmatprep.mubr.msk.f32.mxu1 %vm4298_vm5, %v4299_v8 }
0x1653   :  { %v3829_v26 = vpop.f32.mrb[22].mxu1 }
0x1654   :  { %v3114_v27 = vadd.f32 %v3829_v26, %v3471_v33  ;;  %v3108_v28 = vpop.f32.mrb[23].mxu1 }
0x1655   :  { %v3109_v29 = vadd.f32 %v3471_v33, %v3108_v28 }
0x1656   :  { %v3118_v30 = vmul.f32 %v3114_v27, %v3114_v27 }
0x1657   :  { %v3117_v10 = vmul.f32 %v3109_v29, %v3109_v29 }
0x1658   :  { %v3120_v31 = vmul.f32 %v3118_v30, %v3114_v27 }
0x1659   :  { %v3119_v32 = vmul.f32 %v3117_v10, %v3109_v29 }
0x165a   :  { %v3122_v34 = vmul.f32 0.044715, %v3120_v31 }
0x165b   :  { %v3121_v36 = vmul.f32 0.044715, %v3119_v32 }
0x165c   :  { %v3124_v37 = vadd.f32 %v3122_v34, %v3114_v27 }
0x165d   :  { %v3123_v39 = vadd.f32 %v3121_v36, %v3109_v29 }
0x165e   :  { %v3126_v42 = vmul.f32 0.7978846, %v3124_v37 }
0x165f   :  { %v3125_v43 = vmul.f32 0.7978846, %v3123_v39 }
0x1660   :  { %4223 = vtanh.f32 %v3126_v42 }
0x1661   :  { %4225 = vtanh.f32 %v3125_v43 }
0x166a   :  { %v4224_v44 = vpop.eup %4223 }
0x166b   :  { %v4226_v45 = vpop.eup %4225  ;;  %v3130_v40 = vadd.f32 1.0, %v4224_v44 }
0x166c   :  { %v3129_v46 = vadd.f32 1.0, %v4226_v45 }
0x166d   :  { %v3132_v48 = vmul.f32 0.5, %v3130_v40 }
0x166e   :  { %v3131_v47 = vmul.f32 0.5, %v3129_v46 }
0x166f   :  { %v3134_v38 = vmul.f32 %v3132_v48, %v3114_v27 }
0x1670   :  { %v3133_v49 = vmul.f32 %v3131_v47, %v3109_v29 }
0x1672   :  { %3846 = vmatprep.mubr.msk.f32.mxu0 %vm1595_vm4, %v3133_v49 }
0x1673   :  { %3847 = vmatmul.mubr.msk.f32.vlgmr.msra.gmra.mrb[22].mxu0 %vm1595_vm4, %v3134_v38 }
0x1746   :  { %v3848_v51 = vpop.f32.mrb[22].mxu0 }
0x1747   :  { %v3213_v52 = vpop.f32.mrb[23].mxu0  ;;  %v3219_v53 = vadd.f32 %v3848_v51, %v3474_v50 }
0x1748   :  { %v3214_v5 = vadd.f32 %v3474_v50, %v3213_v52 }
0x1749   :  { %v3223_v55 = vadd.f32 %v3219_v53, %v3029_v17 }
0x174a   :  { %v3222_v3 = vadd.f32 %v3214_v5, %v3028_v9 }
0x174b   :  { %v3227_v56 = vsel %vm127_vm0, %v3223_v55, 0.0 }
0x174c   :  { %v3224_v54 = vsel %vm127_vm0, %v3222_v3, 0.0 }
0x174d   :  { %3225 = vadd.xlane.f32.xlu0 %v3224_v54 }
0x1751   :  { %3228 = vadd.xlane.f32.xlu0 %v3227_v56 }
0x17da   :  { %v3226_v57 = vpop.xlane.xlu0 %3225 }
0x17db   :  { %v3230_v58 = vmul.f32 0.03125, %v3226_v57 }
0x17dd   :  { %v3232_v59 = vsub.f32 %v3222_v3, %v3230_v58 }
0x17de   :  { %v3229_v61 = vpop.xlane.xlu0 %3228 }
0x17df   :  { %v3231_v62 = vmul.f32 0.03125, %v3229_v61  ;;  %v3234_v0 = vmul.f32 %v3232_v59, %v3232_v59 }
0x17e1   :  { %v3233_v1 = vsub.f32 %v3223_v55, %v3231_v62  ;;  %v3236_v2 = vsel %vm127_vm0, %v3234_v0, 0.0 }
0x17e2   :  { %3237 = vadd.xlane.f32.xlu0 %v3236_v2 }
0x17e3   :  { %v3235_v4 = vmul.f32 %v3233_v1, %v3233_v1 }
0x17e5   :  { %v3239_v41 = vsel %vm127_vm0, %v3235_v4, 0.0 }
0x17e6   :  { %3240 = vadd.xlane.f32.xlu1 %v3239_v41 }
0x186f   :  { %v3238_v11 = vpop.xlane.xlu0 %3237 }
0x1870   :  { %v3242_v12 = vmul.f32 0.03125, %v3238_v11 }
0x1872   :  { %v3244_v13 = vadd.f32 1e-12, %v3242_v12 }
0x1873   :  { %v3241_v14 = vpop.xlane.xlu1 %3240 }
0x1874   :  { %4227 = vrsqrt.f32 %v3244_v13  ;;  %v3243_v15 = vmul.f32 0.03125, %v3241_v14 }
0x1876   :  { %v3245_v9 = vadd.f32 1e-12, %v3243_v15 }
0x1878   :  { %4229 = vrsqrt.f32 %v3245_v9 }
0x187e   :  { %v4228_v16 = vpop.eup %4227 }
0x187f   :  { %v3248_v17 = vmul.f32 %v4228_v16, %v3232_v59 }
0x1881   :  { %v3256_v63 = vmul.f32 %v3477_v7, %v3248_v17 }
0x1882   :  { %v4230_v18 = vpop.eup %4229 }
0x1883   :  { %v3249_v19 = vmul.f32 %v4230_v18, %v3233_v1  ;;  %v3264_v60 = vadd.f32 %v3478_v20, %v3256_v63 }
0x1885   :  { %v3257_v21 = vmul.f32 %v3477_v7, %v3249_v19 }
0x1887   :  { %v3265_v22 = vadd.f32 %v3478_v20, %v3257_v21 }
0x1889   :  { %v4001_v23 = vpack.c.bf16 %v3265_v22, %v3264_v60 }
0x188b   :  { %4002 = vmatpush3.bf16.msra.mxu1 %v4001_v23 }
0x188e   :  { %3854 = vmatmul.mubr.msk.f32.vlgmr.msra.gmra.mrb[24].mxu1 %vm382_vm3, %v3266_v24 }
0x1961   :  { %v3336_v25 = vpop.f32.mrb[24].mxu1 }
0x1962   :  { %3341 = vst.msk [vmem:[#allocation2] sm:$0x3] %vm3340_vm6, %v3336_v25  ;;  %v3855_v35 = vpop.f32.mrb[25].mxu1 }
0x1963   :  { %4244 = shalt.err (!%p4241_p4)
}
0x1964   :  { %s4245_s27 = scalar_lea.hbm %s4454_s4, 32 }
0x1965   :  { %p4246_p5 = scmp.ne.s32.totalorder %s4454_s4, %s4245_s27  ;;  %p4249_p6 = scmp.lt.u32.totalorder %s4245_s27, %s4454_s4 }
0x1967   :  { %p4251_p7 = pnand %p4249_p6, %p4246_p5 }
0x1969   :  { %4254 = shalt.err (!%p4251_p7)
}
0x196a   :  { %3351 = dma.vmem_to_hbm [thread:$0]  %s3349_s26, 32, %s4454_s4, [#allocation3]  }
0x196b   :  { %4255 = dma.done.wait [#allocation3], 32  }
0x196c   :  { %4256 = vsyncadd [#allocation3], 4294967264 }
0x196d   :  { %3355 = vsyncpa [#allocation3], 1 }

</bundles_post_ra>
